<compile_context>
chip_gen: v7x
topology: tpu7x:2x2x1
jax: 0.10.0
libtpu: 0.0.40
codegen_flags: <defaults>
</compile_context>

<pallas_src>
import jax
import jax.numpy as jnp
from jax.experimental import pallas as pl
from jax.experimental.pallas import tpu as pltpu

_LANE = 128
_SUBLANE = 8
_MIN_SPLIT_ROWS = 256          # only shard the batch axis when each half >= this
_NEG_INF = -1e30               # mask value baked into padded b3 lanes
_VMEM_LIMIT_BYTES = 48 * 1024 * 1024


def _round_up(n, m):
    return ((n + m - 1) // m) * m


def actor_kernel(x_ref, w1_ref, b1_ref, w2_ref, b2_ref, w3_ref, b3_ref, o_ref):
    """Whole forward pass for one batch tile, entirely in VMEM.

    x / W are bf16 (MXU fast path); accumulation and biases are f32.  Padded
    action lanes carry a -1e30 bias (their w3 columns are zero), so they vanish
    under the numerically-stable softmax without any in-kernel masking.
    """
    x = x_ref[...]

    # fc1 + ReLU
    h1 = jnp.dot(x, w1_ref[...], preferred_element_type=jnp.float32) + b1_ref[...]
    h1 = jnp.maximum(h1, 0.0).astype(jnp.bfloat16)

    # fc2 + ReLU
    h2 = jnp.dot(h1, w2_ref[...], preferred_element_type=jnp.float32) + b2_ref[...]
    h2 = jnp.maximum(h2, 0.0).astype(jnp.bfloat16)

    # fc3 (padded action lanes end up at ~-1e30 via the bias)
    logits = jnp.dot(h2, w3_ref[...], preferred_element_type=jnp.float32) + b3_ref[...]

    # softmax(dim=-1), numerically stable; reciprocal goes to the EUP slot.
    m = jnp.max(logits, axis=-1, keepdims=True)
    e = jnp.exp(logits - m)
    denom = jnp.sum(e, axis=-1, keepdims=True)
    o_ref[...] = (e * pl.reciprocal(denom, approx=True)).astype(o_ref.dtype)


def init_actor_params(key, n_state, n_action, hidden1=400, hidden2=300):
    """nn.Linear default init: U(-1/sqrt(fan_in), +1/sqrt(fan_in)), weights (in, out)."""
    ks = jax.random.split(key, 6)

    def linear(kw, kb, fan_in, fan_out):
        bound = 1.0 / jnp.sqrt(jnp.asarray(fan_in, jnp.float32))
        w = jax.random.uniform(kw, (fan_in, fan_out), jnp.float32, -bound, bound)
        b = jax.random.uniform(kb, (1, fan_out), jnp.float32, -bound, bound)
        return w, b

    w1, b1 = linear(ks[0], ks[1], n_state, hidden1)
    w2, b2 = linear(ks[2], ks[3], hidden1, hidden2)
    w3, b3 = linear(ks[4], ks[5], hidden2, n_action)
    return {"w1": w1, "b1": b1, "w2": w2, "b2": b2, "w3": w3, "b3": b3}


def prepare_actor_params(params):
    """Zero-pad hidden dims to 128 multiples, pad the action dim with a -1e30 bias,
    and cast weights to bf16.

    Zero weight columns feeding a ReLU layer (and zero rows consuming them) are
    mathematically identical to the unpadded network.  The padded action columns
    of w3 are zero, so their logits equal b3's pad value (-1e30) and get zero
    softmax weight — no in-kernel mask needed.  Biases stay f32.
    """
    w1, b1, w2, b2, w3, b3 = (params["w1"], params["b1"], params["w2"],
                              params["b2"], params["w3"], params["b3"])
    n_state, h1 = w1.shape
    h2 = w2.shape[1]
    n_action = w3.shape[1]
    h1p = _round_up(h1, _LANE)
    h2p = _round_up(h2, _LANE)
    ap = _round_up(n_action, _LANE)

    def pad2(a, rows, cols, fill=0.0):
        return jnp.pad(a, ((0, rows - a.shape[0]), (0, cols - a.shape[1])),
                       constant_values=fill)

    return {
        "w1": pad2(w1, n_state, h1p).astype(jnp.bfloat16),
        "b1": pad2(b1, 1, h1p).astype(jnp.float32),
        "w2": pad2(w2, h1p, h2p).astype(jnp.bfloat16),
        "b2": pad2(b2, 1, h2p).astype(jnp.float32),
        "w3": pad2(w3, h2p, ap).astype(jnp.bfloat16),
        # Padded action lanes get a huge negative bias -> softmax weight 0.
        "b3": pad2(b3, 1, ap, fill=_NEG_INF).astype(jnp.float32),
        "n_action": n_action,
    }


def _build_actor_call(*, bt, b_pad, n_state, h1p, h2p, ap, out_dtype,
                      flops, transcendentals, bytes_accessed,
                      vmem_limit_bytes, buffered_weights):
    const = lambda i: (0, 0)  # weights/biases resident for every batch tile
    if buffered_weights:
        # Constant index_map -> never re-DMA'd; single buffer frees VMEM headroom.
        wspec = lambda shape: pl.BlockSpec(shape, const, pipeline_mode=pl.Buffered(1))
    else:
        wspec = lambda shape: pl.BlockSpec(shape, const)

    return pl.pallas_call(
        actor_kernel,
        out_shape=jax.ShapeDtypeStruct((b_pad, ap), out_dtype),
        grid_spec=pltpu.PrefetchScalarGridSpec(
            num_scalar_prefetch=0,
            grid=(b_pad // bt,),
            in_specs=[
                pl.BlockSpec((bt, n_state), lambda i: (i, 0)),
                wspec((n_state, h1p)),
                wspec((1, h1p)),
                wspec((h1p, h2p)),
                wspec((1, h2p)),
                wspec((h2p, ap)),
                wspec((1, ap)),
            ],
            out_specs=pl.BlockSpec((bt, ap), lambda i: (i, 0)),
        ),
        compiler_params=pltpu.CompilerParams(
            dimension_semantics=("parallel",),
            vmem_limit_bytes=vmem_limit_bytes,
        ),
        cost_estimate=pl.CostEstimate(
            flops=flops,
            transcendentals=transcendentals,
            bytes_accessed=bytes_accessed,
        ),
    )


def actor_forward(x, kparams, *, batch_tile=1024, out_dtype=jnp.bfloat16):
    """Pallas wrapper. x: (B, n_state) f32/bf16. kparams: prepare_actor_params output.

    batch_tile: max rows per grid step (1024 default; 2048 is fine with the
    explicit vmem limit).  Returns (B, n_action) softmax probabilities.
    """
    w1, b1 = kparams["w1"], kparams["b1"]
    w2, b2 = kparams["w2"], kparams["b2"]
    w3, b3 = kparams["w3"], kparams["b3"]
    n_action = kparams["n_action"]

    B, n_state = x.shape
    h1p, h2p, ap = w1.shape[1], w2.shape[1], w3.shape[1]

    # Batch tile: as large as the batch allows (per-grid-step overhead dominates
    # this tiny MLP), sublane aligned, capped at batch_tile so VMEM stays bounded.
    bt = max(_SUBLANE, _round_up(min(batch_tile, B), _SUBLANE))
    b_pad = _round_up(B, bt)
    # Shard the batch axis in two (v7x megacore) only when each half tile stays
    # MXU-friendly; on 1-TC chips (v5e/v6e) a single large tile is strictly
    # faster for small batches, so we never force-split those.
    if b_pad // bt == 1 and B >= 2 * _MIN_SPLIT_ROWS:
        bt = _round_up((B + 1) // 2, _SUBLANE)
        b_pad = _round_up(B, bt)

    xb = x.astype(jnp.bfloat16)
    if b_pad != B:
        xb = jnp.pad(xb, ((0, b_pad - B), (0, 0)))

    # Only raise the scoped-VMEM cap when the big tile actually needs it
    # (v5e default is 16 MiB scoped; 48 MiB is safe under v7x's 64 MiB physical).
    vmem_limit_bytes = _VMEM_LIMIT_BYTES if bt > 512 else None

    out_itemsize = jnp.dtype(out_dtype).itemsize
    flops = 2 * b_pad * (n_state * h1p + h1p * h2p + h2p * ap)
    transcendentals = b_pad * ap
    bytes_accessed = int(
        xb.size * 2
        + (w1.size + w2.size + w3.size) * 2
        + (b1.size + b2.size + b3.size) * 4
        + b_pad * ap * out_itemsize
    )

    common = dict(bt=bt, b_pad=b_pad, n_state=n_state, h1p=h1p, h2p=h2p, ap=ap,
                  out_dtype=out_dtype, flops=flops, transcendentals=transcendentals,
                  bytes_accessed=bytes_accessed, vmem_limit_bytes=vmem_limit_bytes)
    args = (xb, w1, b1, w2, b2, w3, b3)
    try:
        out = _build_actor_call(buffered_weights=True, **common)(*args)
    except Exception:
        # Fall back to default double-buffered weight specs if this Pallas build
        # doesn't support pipeline_mode on the implicit pipeline.
        out = _build_actor_call(buffered_weights=False, **common)(*args)

    # Drop batch padding and padded action lanes.
    return out[:B, :n_action]


def actor_reference(x, params):
    """Pure-JAX f32 reference (matches the PyTorch module exactly)."""
    h1 = jnp.maximum(x @ params["w1"] + params["b1"], 0.0)
    h2 = jnp.maximum(h1 @ params["w2"] + params["b2"], 0.0)
    logits = h2 @ params["w3"] + params["b3"]
    return jax.nn.softmax(logits, axis=-1)


if __name__ == "__main__":
    key = jax.random.PRNGKey(0)
    k_param, k_x, k_x2 = jax.random.split(key, 3)

    # Shapes consistent with Actor(n_state=32, n_action=8), default hidden
    # sizes (400, 300).
    B, n_state, n_action = 32, 32, 8
    params = init_actor_params(k_param, n_state, n_action, hidden1=400, hidden2=300)
    kparams = prepare_actor_params(params)

    # Small batch: single grid step, no forced split (1-TC friendly path).
    x = jax.random.normal(k_x, (B, n_state), jnp.float32)
    out = jax.block_until_ready(actor_forward(x, kparams))
    ref = actor_reference(x, params)
    assert out.shape == (B, n_action)
    out_f32 = out.astype(jnp.float32)
    assert jnp.allclose(jnp.sum(out_f32, axis=-1), 1.0, atol=1e-2)
    assert jnp.allclose(out_f32, ref, atol=2e-2)

    # Larger batch: exercises the 2-tile (megacore-shardable) path and padding.
    B2 = 640
    x2 = jax.random.normal(k_x2, (B2, n_state), jnp.float32)
    out2 = jax.block_until_ready(actor_forward(x2, kparams))
    ref2 = actor_reference(x2, params)
    assert out2.shape == (B2, n_action)
    assert jnp.allclose(out2.astype(jnp.float32), ref2, atol=2e-2)

    print("KERNEL_OK")
</pallas_src>

<mosaic_0001>
module attributes {stable_mosaic.version = 11 : i64} {
  func.func @actor_kernel(%arg0: i32, %arg1: memref<32x32xbf16, #tpu.memory_space<vmem>>, %arg2: memref<32x512xbf16, #tpu.memory_space<vmem>>, %arg3: memref<1x512xf32, #tpu.memory_space<vmem>>, %arg4: memref<512x384xbf16, #tpu.memory_space<vmem>>, %arg5: memref<1x384xf32, #tpu.memory_space<vmem>>, %arg6: memref<384x128xbf16, #tpu.memory_space<vmem>>, %arg7: memref<1x128xf32, #tpu.memory_space<vmem>>, %arg8: memref<32x128xbf16, #tpu.memory_space<vmem>>) attributes {dimension_semantics = [#tpu.dimension_semantics<parallel>], iteration_bounds = array<i64: 1>, scalar_prefetch = 0 : i64, scratch_operands = 0 : i64, tpu.core_type = #tpu.core_type<tc>, window_params = [{transform_indices = @transform_0, window_bounds = array<i64: 32, 32>}, {pipeline_mode = #tpu.pipeline_mode<synchronous>, transform_indices = @transform_1, window_bounds = array<i64: 32, 512>}, {pipeline_mode = #tpu.pipeline_mode<synchronous>, transform_indices = @transform_2, window_bounds = array<i64: 1, 512>}, {pipeline_mode = #tpu.pipeline_mode<synchronous>, transform_indices = @transform_3, window_bounds = array<i64: 512, 384>}, {pipeline_mode = #tpu.pipeline_mode<synchronous>, transform_indices = @transform_4, window_bounds = array<i64: 1, 384>}, {pipeline_mode = #tpu.pipeline_mode<synchronous>, transform_indices = @transform_5, window_bounds = array<i64: 384, 128>}, {pipeline_mode = #tpu.pipeline_mode<synchronous>, transform_indices = @transform_6, window_bounds = array<i64: 1, 128>}, {transform_indices = @transform_7, window_bounds = array<i64: 32, 128>}]} {
    %c0 = arith.constant 0 : index
    %c0_0 = arith.constant 0 : index
    %0 = vector.load %arg1[%c0, %c0_0] : memref<32x32xbf16, #tpu.memory_space<vmem>>, vector<32x32xbf16>
    %c0_1 = arith.constant 0 : index
    %c0_2 = arith.constant 0 : index
    %1 = vector.load %arg2[%c0_1, %c0_2] : memref<32x512xbf16, #tpu.memory_space<vmem>>, vector<32x512xbf16>
    %cst = arith.constant dense<0.000000e+00> : vector<32x512xf32>
    %2 = tpu.matmul %0, %1, %cst {dimension_numbers = #tpu.dot_dimension_numbers<[1], [0], [0], [1], [0, 0, 1, 1], [], []>} : vector<32x32xbf16>, vector<32x512xbf16>, vector<32x512xf32> -> vector<32x512xf32>
    %c0_3 = arith.constant 0 : index
    %c0_4 = arith.constant 0 : index
    %3 = vector.load %arg3[%c0_3, %c0_4] : memref<1x512xf32, #tpu.memory_space<vmem>>, vector<1x512xf32>
    %4 = vector.broadcast %3 : vector<1x512xf32> to vector<32x512xf32>
    %5 = arith.addf %2, %4 : vector<32x512xf32>
    %cst_5 = arith.constant 0.000000e+00 : f32
    %6 = vector.broadcast %cst_5 : f32 to vector<32x512xf32>
    %7 = arith.maximumf %5, %6 : vector<32x512xf32>
    %8 = arith.truncf %7 : vector<32x512xf32> to vector<32x512xbf16>
    %c0_6 = arith.constant 0 : index
    %c0_7 = arith.constant 0 : index
    %9 = vector.load %arg4[%c0_6, %c0_7] : memref<512x384xbf16, #tpu.memory_space<vmem>>, vector<512x384xbf16>
    %cst_8 = arith.constant dense<0.000000e+00> : vector<32x384xf32>
    %10 = tpu.matmul %8, %9, %cst_8 {dimension_numbers = #tpu.dot_dimension_numbers<[1], [0], [0], [1], [0, 0, 1, 1], [], []>} : vector<32x512xbf16>, vector<512x384xbf16>, vector<32x384xf32> -> vector<32x384xf32>
    %c0_9 = arith.constant 0 : index
    %c0_10 = arith.constant 0 : index
    %11 = vector.load %arg5[%c0_9, %c0_10] : memref<1x384xf32, #tpu.memory_space<vmem>>, vector<1x384xf32>
    %12 = vector.broadcast %11 : vector<1x384xf32> to vector<32x384xf32>
    %13 = arith.addf %10, %12 : vector<32x384xf32>
    %cst_11 = arith.constant 0.000000e+00 : f32
    %14 = vector.broadcast %cst_11 : f32 to vector<32x384xf32>
    %15 = arith.maximumf %13, %14 : vector<32x384xf32>
    %16 = arith.truncf %15 : vector<32x384xf32> to vector<32x384xbf16>
    %c0_12 = arith.constant 0 : index
    %c0_13 = arith.constant 0 : index
    %17 = vector.load %arg6[%c0_12, %c0_13] : memref<384x128xbf16, #tpu.memory_space<vmem>>, vector<384x128xbf16>
    %cst_14 = arith.constant dense<0.000000e+00> : vector<32x128xf32>
    %18 = tpu.matmul %16, %17, %cst_14 {dimension_numbers = #tpu.dot_dimension_numbers<[1], [0], [0], [1], [0, 0, 1, 1], [], []>} : vector<32x384xbf16>, vector<384x128xbf16>, vector<32x128xf32> -> vector<32x128xf32>
    %c0_15 = arith.constant 0 : index
    %c0_16 = arith.constant 0 : index
    %19 = vector.load %arg7[%c0_15, %c0_16] : memref<1x128xf32, #tpu.memory_space<vmem>>, vector<1x128xf32>
    %20 = vector.broadcast %19 : vector<1x128xf32> to vector<32x128xf32>
    %21 = arith.addf %18, %20 : vector<32x128xf32>
    %cst_17 = arith.constant dense<0xFF800000> : vector<32xf32>
    %22 = vector.multi_reduction <maximumf>, %21, %cst_17 [1] : vector<32x128xf32> to vector<32xf32>
    %23 = vector.shape_cast %22 : vector<32xf32> to vector<32x1xf32>
    %24 = vector.broadcast %23 : vector<32x1xf32> to vector<32x128xf32>
    %25 = arith.subf %21, %24 : vector<32x128xf32>
    %26 = math.exp %25 : vector<32x128xf32>
    %cst_18 = arith.constant dense<0.000000e+00> : vector<32xf32>
    %27 = vector.multi_reduction <add>, %26, %cst_18 [1] : vector<32x128xf32> to vector<32xf32>
    %28 = vector.shape_cast %27 : vector<32xf32> to vector<32x1xf32>
    %29 = tpu.reciprocal %28 {approx = true} : vector<32x1xf32> -> vector<32x1xf32>
    %30 = vector.broadcast %29 : vector<32x1xf32> to vector<32x128xf32>
    %31 = arith.mulf %26, %30 : vector<32x128xf32>
    %32 = arith.truncf %31 : vector<32x128xf32> to vector<32x128xbf16>
    %c0_19 = arith.constant 0 : index
    %c0_20 = arith.constant 0 : index
    %33 = vector.load %arg8[%c0_19, %c0_20] : memref<32x128xbf16, #tpu.memory_space<vmem>>, vector<32x128xbf16>
    tpu.vector_store %arg8[%c0_19, %c0_20], %32 {strides = array<i32>} : memref<32x128xbf16, #tpu.memory_space<vmem>>, vector<32x128xbf16>,
    return
  }
  func.func @transform_0(%arg0: i32) -> (i32, i32) {
    %c0_i32 = arith.constant 0 : i32
    %c0_i32_0 = arith.constant 0 : i32
    return %arg0, %c0_i32 : i32, i32
  }
  func.func @transform_1(%arg0: i32) -> (i32, i32) {
    %c0_i32 = arith.constant 0 : i32
    %c0_i32_0 = arith.constant 0 : i32
    %c0_i32_1 = arith.constant 0 : i32
    return %c0_i32, %c0_i32_0 : i32, i32
  }
  func.func @transform_2(%arg0: i32) -> (i32, i32) {
    %c0_i32 = arith.constant 0 : i32
    %c0_i32_0 = arith.constant 0 : i32
    %c0_i32_1 = arith.constant 0 : i32
    return %c0_i32, %c0_i32_0 : i32, i32
  }
  func.func @transform_3(%arg0: i32) -> (i32, i32) {
    %c0_i32 = arith.constant 0 : i32
    %c0_i32_0 = arith.constant 0 : i32
    %c0_i32_1 = arith.constant 0 : i32
    return %c0_i32, %c0_i32_0 : i32, i32
  }
  func.func @transform_4(%arg0: i32) -> (i32, i32) {
    %c0_i32 = arith.constant 0 : i32
    %c0_i32_0 = arith.constant 0 : i32
    %c0_i32_1 = arith.constant 0 : i32
    return %c0_i32, %c0_i32_0 : i32, i32
  }
  func.func @transform_5(%arg0: i32) -> (i32, i32) {
    %c0_i32 = arith.constant 0 : i32
    %c0_i32_0 = arith.constant 0 : i32
    %c0_i32_1 = arith.constant 0 : i32
    return %c0_i32, %c0_i32_0 : i32, i32
  }
  func.func @transform_6(%arg0: i32) -> (i32, i32) {
    %c0_i32 = arith.constant 0 : i32
    %c0_i32_0 = arith.constant 0 : i32
    %c0_i32_1 = arith.constant 0 : i32
    return %c0_i32, %c0_i32_0 : i32, i32
  }
  func.func @transform_7(%arg0: i32) -> (i32, i32) {
    %c0_i32 = arith.constant 0 : i32
    %c0_i32_0 = arith.constant 0 : i32
    return %arg0, %c0_i32 : i32, i32
  }
}

module attributes {stable_mosaic.version = 11 : i64} {
  func.func @actor_kernel(%arg0: i32, %arg1: memref<32x32xbf16, #tpu.memory_space<vmem>>, %arg2: memref<32x512xbf16, #tpu.memory_space<vmem>>, %arg3: memref<1x512xf32, #tpu.memory_space<vmem>>, %arg4: memref<512x384xbf16, #tpu.memory_space<vmem>>, %arg5: memref<1x384xf32, #tpu.memory_space<vmem>>, %arg6: memref<384x128xbf16, #tpu.memory_space<vmem>>, %arg7: memref<1x128xf32, #tpu.memory_space<vmem>>, %arg8: memref<32x128xbf16, #tpu.memory_space<vmem>>) attributes {dimension_semantics = [#tpu.dimension_semantics<parallel>], iteration_bounds = array<i64: 1>, scalar_prefetch = 0 : i64, scratch_operands = 0 : i64, tpu.core_type = #tpu.core_type<tc>, window_params = [{transform_indices = @transform_0, window_bounds = array<i64: 32, 32>}, {pipeline_mode = #tpu.pipeline_mode<synchronous>, transform_indices = @transform_1, window_bounds = array<i64: 32, 512>}, {pipeline_mode = #tpu.pipeline_mode<synchronous>, transform_indices = @transform_2, window_bounds = array<i64: 1, 512>}, {pipeline_mode = #tpu.pipeline_mode<synchronous>, transform_indices = @transform_3, window_bounds = array<i64: 512, 384>}, {pipeline_mode = #tpu.pipeline_mode<synchronous>, transform_indices = @transform_4, window_bounds = array<i64: 1, 384>}, {pipeline_mode = #tpu.pipeline_mode<synchronous>, transform_indices = @transform_5, window_bounds = array<i64: 384, 128>}, {pipeline_mode = #tpu.pipeline_mode<synchronous>, transform_indices = @transform_6, window_bounds = array<i64: 1, 128>}, {transform_indices = @transform_7, window_bounds = array<i64: 32, 128>}]} {
    %c0 = arith.constant 0 : index
    %c0_0 = arith.constant 0 : index
    %0 = vector.load %arg1[%c0, %c0_0] : memref<32x32xbf16, #tpu.memory_space<vmem>>, vector<32x32xbf16>
    %c0_1 = arith.constant 0 : index
    %c0_2 = arith.constant 0 : index
    %1 = vector.load %arg2[%c0_1, %c0_2] : memref<32x512xbf16, #tpu.memory_space<vmem>>, vector<32x512xbf16>
    %cst = arith.constant dense<0.000000e+00> : vector<32x512xf32>
    %2 = tpu.matmul %0, %1, %cst {dimension_numbers = #tpu.dot_dimension_numbers<[1], [0], [0], [1], [0, 0, 1, 1], [], []>} : vector<32x32xbf16>, vector<32x512xbf16>, vector<32x512xf32> -> vector<32x512xf32>
    %c0_3 = arith.constant 0 : index
    %c0_4 = arith.constant 0 : index
    %3 = vector.load %arg3[%c0_3, %c0_4] : memref<1x512xf32, #tpu.memory_space<vmem>>, vector<1x512xf32>
    %4 = vector.broadcast %3 : vector<1x512xf32> to vector<32x512xf32>
    %5 = arith.addf %2, %4 : vector<32x512xf32>
    %cst_5 = arith.constant 0.000000e+00 : f32
    %6 = vector.broadcast %cst_5 : f32 to vector<32x512xf32>
    %7 = arith.maximumf %5, %6 : vector<32x512xf32>
    %8 = arith.truncf %7 : vector<32x512xf32> to vector<32x512xbf16>
    %c0_6 = arith.constant 0 : index
    %c0_7 = arith.constant 0 : index
    %9 = vector.load %arg4[%c0_6, %c0_7] : memref<512x384xbf16, #tpu.memory_space<vmem>>, vector<512x384xbf16>
    %cst_8 = arith.constant dense<0.000000e+00> : vector<32x384xf32>
    %10 = tpu.matmul %8, %9, %cst_8 {dimension_numbers = #tpu.dot_dimension_numbers<[1], [0], [0], [1], [0, 0, 1, 1], [], []>} : vector<32x512xbf16>, vector<512x384xbf16>, vector<32x384xf32> -> vector<32x384xf32>
    %c0_9 = arith.constant 0 : index
    %c0_10 = arith.constant 0 : index
    %11 = vector.load %arg5[%c0_9, %c0_10] : memref<1x384xf32, #tpu.memory_space<vmem>>, vector<1x384xf32>
    %12 = vector.broadcast %11 : vector<1x384xf32> to vector<32x384xf32>
    %13 = arith.addf %10, %12 : vector<32x384xf32>
    %cst_11 = arith.constant 0.000000e+00 : f32
    %14 = vector.broadcast %cst_11 : f32 to vector<32x384xf32>
    %15 = arith.maximumf %13, %14 : vector<32x384xf32>
    %16 = arith.truncf %15 : vector<32x384xf32> to vector<32x384xbf16>
    %c0_12 = arith.constant 0 : index
    %c0_13 = arith.constant 0 : index
    %17 = vector.load %arg6[%c0_12, %c0_13] : memref<384x128xbf16, #tpu.memory_space<vmem>>, vector<384x128xbf16>
    %cst_14 = arith.constant dense<0.000000e+00> : vector<32x128xf32>
    %18 = tpu.matmul %16, %17, %cst_14 {dimension_numbers = #tpu.dot_dimension_numbers<[1], [0], [0], [1], [0, 0, 1, 1], [], []>} : vector<32x384xbf16>, vector<384x128xbf16>, vector<32x128xf32> -> vector<32x128xf32>
    %c0_15 = arith.constant 0 : index
    %c0_16 = arith.constant 0 : index
    %19 = vector.load %arg7[%c0_15, %c0_16] : memref<1x128xf32, #tpu.memory_space<vmem>>, vector<1x128xf32>
    %20 = vector.broadcast %19 : vector<1x128xf32> to vector<32x128xf32>
    %21 = arith.addf %18, %20 : vector<32x128xf32>
    %cst_17 = arith.constant dense<0xFF800000> : vector<32xf32>
    %22 = vector.multi_reduction <maximumf>, %21, %cst_17 [1] : vector<32x128xf32> to vector<32xf32>
    %23 = vector.shape_cast %22 : vector<32xf32> to vector<32x1xf32>
    %24 = vector.broadcast %23 : vector<32x1xf32> to vector<32x128xf32>
    %25 = arith.subf %21, %24 : vector<32x128xf32>
    %26 = math.exp %25 : vector<32x128xf32>
    %cst_18 = arith.constant dense<0.000000e+00> : vector<32xf32>
    %27 = vector.multi_reduction <add>, %26, %cst_18 [1] : vector<32x128xf32> to vector<32xf32>
    %28 = vector.shape_cast %27 : vector<32xf32> to vector<32x1xf32>
    %29 = tpu.reciprocal %28 {approx = true} : vector<32x1xf32> -> vector<32x1xf32>
    %30 = vector.broadcast %29 : vector<32x1xf32> to vector<32x128xf32>
    %31 = arith.mulf %26, %30 : vector<32x128xf32>
    %32 = arith.truncf %31 : vector<32x128xf32> to vector<32x128xbf16>
    %c0_19 = arith.constant 0 : index
    %c0_20 = arith.constant 0 : index
    %33 = vector.load %arg8[%c0_19, %c0_20] : memref<32x128xbf16, #tpu.memory_space<vmem>>, vector<32x128xbf16>
    tpu.vector_store %arg8[%c0_19, %c0_20], %32 {strides = array<i32>} : memref<32x128xbf16, #tpu.memory_space<vmem>>, vector<32x128xbf16>,
    return
  }
  func.func @transform_0(%arg0: i32) -> (i32, i32) {
    %c0_i32 = arith.constant 0 : i32
    %c0_i32_0 = arith.constant 0 : i32
    return %arg0, %c0_i32 : i32, i32
  }
  func.func @transform_1(%arg0: i32) -> (i32, i32) {
    %c0_i32 = arith.constant 0 : i32
    %c0_i32_0 = arith.constant 0 : i32
    %c0_i32_1 = arith.constant 0 : i32
    return %c0_i32, %c0_i32_0 : i32, i32
  }
  func.func @transform_2(%arg0: i32) -> (i32, i32) {
    %c0_i32 = arith.constant 0 : i32
    %c0_i32_0 = arith.constant 0 : i32
    %c0_i32_1 = arith.constant 0 : i32
    return %c0_i32, %c0_i32_0 : i32, i32
  }
  func.func @transform_3(%arg0: i32) -> (i32, i32) {
    %c0_i32 = arith.constant 0 : i32
    %c0_i32_0 = arith.constant 0 : i32
    %c0_i32_1 = arith.constant 0 : i32
    return %c0_i32, %c0_i32_0 : i32, i32
  }
  func.func @transform_4(%arg0: i32) -> (i32, i32) {
    %c0_i32 = arith.constant 0 : i32
    %c0_i32_0 = arith.constant 0 : i32
    %c0_i32_1 = arith.constant 0 : i32
    return %c0_i32, %c0_i32_0 : i32, i32
  }
  func.func @transform_5(%arg0: i32) -> (i32, i32) {
    %c0_i32 = arith.constant 0 : i32
    %c0_i32_0 = arith.constant 0 : i32
    %c0_i32_1 = arith.constant 0 : i32
    return %c0_i32, %c0_i32_0 : i32, i32
  }
  func.func @transform_6(%arg0: i32) -> (i32, i32) {
    %c0_i32 = arith.constant 0 : i32
    %c0_i32_0 = arith.constant 0 : i32
    %c0_i32_1 = arith.constant 0 : i32
    return %c0_i32, %c0_i32_0 : i32, i32
  }
  func.func @transform_7(%arg0: i32) -> (i32, i32) {
    %c0_i32 = arith.constant 0 : i32
    %c0_i32_0 = arith.constant 0 : i32
    return %arg0, %c0_i32 : i32, i32
  }
}

</mosaic_0001>

<bundles_post_ra>
// kernel: tpu_custom_call.1
= control target key start
LH: loop header
LB: loop body
LE: loop exit
PB: predicated region body
PF: predicated region fallthrough
CT: control target
= control target key end

     0   :  { %12 = vsyncpa [#allocation3], 0  ;;  %s2331_s0 = inlined_call_operand.hbm [shape: bf16[32,32], index: 0, kind: input, shape index: {}]   ;;  %s2332_s1 = inlined_call_operand.hbm [shape: bf16[32,512], index: 1, kind: input, shape index: {}]   ;;  %s2333_s2 = inlined_call_operand.vmem [shape: f32[1,512], index: 2, kind: input, shape index: {}]   ;;  %s2334_s3 = inlined_call_operand.hbm [shape: bf16[512,384], index: 3, kind: input, shape index: {}]   ;;  %s2335_s4 = inlined_call_operand.vmem [shape: f32[1,384], index: 4, kind: input, shape index: {}]   ;;  %s2336_s5 = inlined_call_operand.hbm [shape: bf16[384,128], index: 5, kind: input, shape index: {}]   ;;  %s2337_s6 = inlined_call_operand.vmem [shape: f32[1,128], index: 6, kind: input, shape index: {}]   ;;  %s2338_s7 = inlined_call_operand.hbm [shape: bf16[32,128], index: 7, kind: output, shape index: {}]  }
   0x1   :  { %13 = vsyncpa [#allocation6], 0 }
   0x2   :  { %14 = vsyncpa [#allocation9], 0 }
   0x3   :  { %15 = vsyncpa [#allocation4], 0  ;;  %s2151_s24 = smov [#allocation5]   ;;  %s2033_s28 = scalar_lea.hbm %s2332_s1, 1024 }
   0x4   :  { %s33_s25 = sshll.u32 %s2151_s24, 4  ;;  %p2034_p0 = scmp.ne.s32.totalorder %s2332_s1, %s2033_s28  ;;  %s34_s25 = int_to_ptr.vmem [resolvable:$true] %s33_s25 }
   0x5   :  { %p2037_p1 = scmp.lt.u32.totalorder %s2033_s28, %s2332_s1 }
   0x7   :  { %p2039_p2 = pnand %p2037_p1, %p2034_p0 }
   0x9   :  { %2042 = shalt.err (!%p2039_p2)
}
   0xa   :  { %s2043_s10 = scalar_lea.vmem %s34_s25, 1024  ;;  %p2048_p4 = scmp.lt.s32.totalorder %s34_s25, %s34_s25 }
   0xb   :  { %p2044_p3 = scmp.ne.s32.totalorder %s34_s25, %s2043_s10  ;;  %p2049_p5 = scmp.lt.s32.totalorder %s2043_s10, %s2043_s10 }
   0xd   :  { %p2050_p6 = por %p2049_p5, %p2048_p4 }
   0xf   :  { %p2051_p7 = pnand %p2050_p6, %p2044_p3 }
  0x11   :  { %2054 = shalt.err (!%p2051_p7)
}
  0x12   :  { %s2152_s11 = smov 256   ;;  %s2153_s12 = smov 16  }
  0x13   :  { %39 = dma.hbm_to_vmem [thread:$0]  %s2332_s1, 1024, %s34_s25, [#allocation6], %s2152_s11, %s2152_s11, %s2153_s12  }
  0x14   :  { %s2154_s15 = smov [#allocation2]   ;;  %s2055_s19 = scalar_lea.hbm %s2331_s0, 256 }
  0x15   :  { %s21_s16 = sshll.u32 %s2154_s15, 4  ;;  %p2056_p8 = scmp.ne.s32.totalorder %s2331_s0, %s2055_s19  ;;  %s22_s16 = int_to_ptr.vmem [resolvable:$true] %s21_s16 }
  0x16   :  { %p2059_p9 = scmp.lt.u32.totalorder %s2055_s19, %s2331_s0 }
  0x18   :  { %p2061_p10 = pnand %p2059_p9, %p2056_p8 }
  0x1a   :  { %2064 = shalt.err (!%p2061_p10)
}
  0x1b   :  { %s2065_s24 = scalar_lea.vmem %s22_s16, 256  ;;  %p2070_p12 = scmp.lt.s32.totalorder %s22_s16, %s22_s16 }
  0x1c   :  { %p2066_p11 = scmp.ne.s32.totalorder %s22_s16, %s2065_s24  ;;  %p2071_p13 = scmp.lt.s32.totalorder %s2065_s24, %s2065_s24 }
  0x1e   :  { %p2072_p0 = por %p2071_p13, %p2070_p12 }
  0x20   :  { %p2073_p1 = pnand %p2072_p0, %p2066_p11 }
  0x22   :  { %2076 = shalt.err (!%p2073_p1)
}
  0x23   :  { %s2155_s1 = smov 64   ;;  %s2156_s25 = smov 4  }
  0x24   :  { %27 = dma.hbm_to_vmem [thread:$0]  %s2331_s0, 256, %s22_s16, [#allocation3], %s2155_s1, %s2155_s1, %s2156_s25  }
  0x25   :  { %s2157_s28 = smov [#allocation7]   ;;  %s2077_s9 = scalar_lea.hbm %s2334_s3, 12288 }
  0x26   :  { %s47_s29 = sshll.u32 %s2157_s28, 4  ;;  %p2078_p2 = scmp.ne.s32.totalorder %s2334_s3, %s2077_s9  ;;  %s48_s29 = int_to_ptr.vmem [resolvable:$true] %s47_s29 }
  0x27   :  { %p2081_p3 = scmp.lt.u32.totalorder %s2077_s9, %s2334_s3 }
  0x29   :  { %p2083_p4 = pnand %p2081_p3, %p2078_p2 }
  0x2b   :  { %2086 = shalt.err (!%p2083_p4)
}
  0x2c   :  { %s2087_s14 = scalar_lea.vmem %s48_s29, 12288  ;;  %p2092_p6 = scmp.lt.s32.totalorder %s48_s29, %s48_s29 }
  0x2d   :  { %p2088_p5 = scmp.ne.s32.totalorder %s48_s29, %s2087_s14  ;;  %p2093_p7 = scmp.lt.s32.totalorder %s2087_s14, %s2087_s14 }
  0x2f   :  { %p2094_p8 = por %p2093_p7, %p2092_p6 }
  0x31   :  { %p2095_p9 = pnand %p2094_p8, %p2088_p5 }
  0x33   :  { %2098 = shalt.err (!%p2095_p9)
}
  0x34   :  { %s2158_s0 = smov 192   ;;  %s2159_s15 = smov 12  }
  0x35   :  { %53 = dma.hbm_to_vmem [thread:$0]  %s2334_s3, 12288, %s48_s29, [#allocation6], %s2158_s0, %s2158_s0, %s2159_s15  }
  0x36   :  { %s2160_s18 = smov [#allocation8]   ;;  %s2099_s22 = scalar_lea.hbm %s2336_s5, 3072 }
  0x37   :  { %s61_s19 = sshll.u32 %s2160_s18, 4  ;;  %p2100_p10 = scmp.ne.s32.totalorder %s2336_s5, %s2099_s22  ;;  %s62_s19 = int_to_ptr.vmem [resolvable:$true] %s61_s19 }
  0x38   :  { %p2103_p11 = scmp.lt.u32.totalorder %s2099_s22, %s2336_s5 }
  0x3a   :  { %p2105_p12 = pnand %p2103_p11, %p2100_p10 }
  0x3c   :  { %2108 = shalt.err (!%p2105_p12)
}
  0x3d   :  { %s2109_s28 = scalar_lea.vmem %s62_s19, 3072  ;;  %p2114_p0 = scmp.lt.s32.totalorder %s62_s19, %s62_s19 }
  0x3e   :  { %p2110_p13 = scmp.ne.s32.totalorder %s62_s19, %s2109_s28  ;;  %p2115_p1 = scmp.lt.s32.totalorder %s2109_s28, %s2109_s28 }
  0x40   :  { %p2116_p2 = por %p2115_p1, %p2114_p0 }
  0x42   :  { %p2117_p3 = pnand %p2116_p2, %p2110_p13 }
  0x44   :  { %2120 = shalt.err (!%p2117_p3)
}
  0x45   :  { %67 = dma.hbm_to_vmem [thread:$0]  %s2336_s5, 3072, %s62_s19, [#allocation9], %s2155_s1, %s2155_s1, %s2156_s25  }
  0x46   :  { %2143 = dma.done.wait [#allocation3], 256  }
  0x47   :  { %2144 = vsyncadd [#allocation3], 4294967040 }
  0x48   :  { %2145 = dma.done.wait [#allocation6], 13312  }
  0x49   :  { %2146 = vsyncadd [#allocation6], 4294953984 }
  0x4a   :  { %2147 = dma.done.wait [#allocation9], 3072  }
  0x4b   :  { %2148 = vsyncadd [#allocation9], 4294964224  ;;  %v2161_v0 = vmov 0   ;;  %v1851_v1 = vld [vmem:[#allocation5 + $0x4] ss:$16 sps:$4 sm:$0xff]   ;;  %vm167_vm0 = vcmask 261120   ;;  %v97_v61 = vlaneseq }
  0x4c   :  { %206 = vmatprep.mubr.bf16.mxu0 %v2161_v0  ;;  %259 = vmatprep.mubr.bf16.mxu1 %v2161_v0  ;;  %v1853_v2 = vld [vmem:[#allocation5] ss:$16 sps:$4 sm:$0xff]   ;;  %v1854_v3 = vld [vmem:[#allocation5 + $0x24] ss:$16 sps:$4 sm:$0xff]   ;;  %v1859_v6 = vld [vmem:[#allocation5 + $0xc] ss:$16 sps:$4 sm:$0xff]  }
  0x4d   :  { %174 = vmatprep.subr.bf16.mxu0 %v1851_v1  ;;  %v1856_v4 = vld [vmem:[#allocation5 + $0x20] ss:$16 sps:$4 sm:$0xff]   ;;  %v1861_v7 = vld [vmem:[#allocation5 + $0x8] ss:$16 sps:$4 sm:$0xff]   ;;  %v1862_v8 = vld [vmem:[#allocation5 + $0x2c] ss:$16 sps:$4 sm:$0xff]   ;;  %227 = vmatprep.subr.bf16.mxu1 %v1859_v6 }
  0x4e   :  { %175 = vmatpush1.bf16.msra.mxu0 %v1853_v2  ;;  %v1857_v5 = vld [vmem:[#allocation2] sm:$0xff]   ;;  %v1864_v9 = vld [vmem:[#allocation5 + $0x28] ss:$16 sps:$4 sm:$0xff]   ;;  %228 = vmatpush1.bf16.msra.mxu1 %v1861_v7  ;;  %v1865_v10 = vld [vmem:[#allocation7] ss:$12 sps:$4 sm:$0xff]   ;;  %v2261_v62 = vshrl.u32 %v97_v61, 7 }
  0x4f   :  { %176 = vmatprep.subr.bf16.mxu0 %v1854_v3  ;;  %v1867_v11 = vld [vmem:[#allocation7 + $0x4] ss:$12 sps:$4 sm:$0xff]   ;;  %229 = vmatprep.subr.bf16.mxu1 %v1862_v8  ;;  %v1870_v12 = vld [vmem:[#allocation7 + $0x1c] ss:$12 sps:$4 sm:$0xff]   ;;  %v1873_v14 = vld [vmem:[#allocation7 + $0x34] ss:$12 sps:$4 sm:$0xff]  }
  0x50   :  { %v1868_v13 = vld [vmem:[#allocation7 + $0x18] ss:$12 sps:$4 sm:$0xff]   ;;  %v1871_v16 = vld [vmem:[#allocation7 + $0x30] ss:$12 sps:$4 sm:$0xff]   ;;  %v1874_v18 = vld [vmem:[#allocation7 + $0x48] ss:$12 sps:$4 sm:$0xff]  }
  0x51   :  { %v1858_v15 = vld [vmem:[#allocation2 + $0x8] sm:$0xff]   ;;  %v1879_v19 = vld [vmem:[#allocation7 + $0x64] ss:$12 sps:$4 sm:$0xff]   ;;  %v1892_v20 = vld [vmem:[#allocation7 + $0xc8] ss:$12 sps:$4 sm:$0xff]   ;;  %v99_v63 = vsub.s32 0, %v2261_v62 }
  0x52   :  { %177 = vmatpush1.bf16.msra.mxu0 %v1856_v4  ;;  %230 = vmatpush1.bf16.msra.mxu1 %v1864_v9  ;;  %v1876_v17 = vld [vmem:[#allocation7 + $0x4c] ss:$12 sps:$4 sm:$0xff]   ;;  %v1893_v21 = vld [vmem:[#allocation7 + $0x8] ss:$12 sps:$4 sm:$0xff]   ;;  %v1907_v30 = vld [vmem:[#allocation7 + $0x110] ss:$12 sps:$4 sm:$0xff]  }
  0x53   :  { %961 = vmatprep.subr.bf16.mxu0 %v1867_v11  ;;  %v1877_v22 = vld [vmem:[#allocation7 + $0x60] ss:$12 sps:$4 sm:$0xff]   ;;  %v1882_v23 = vld [vmem:[#allocation7 + $0x7c] ss:$12 sps:$4 sm:$0xff]   ;;  %1709 = vmatprep.subr.bf16.mxu1 %v1892_v20  ;;  %v1880_v26 = vld [vmem:[#allocation7 + $0x78] ss:$12 sps:$4 sm:$0xff]  }
  0x54   :  { %v1897_v24 = vld [vmem:[#allocation7 + $0xe0] ss:$12 sps:$4 sm:$0xff]   ;;  %v1902_v27 = vld [vmem:[#allocation7 + $0xf8] ss:$12 sps:$4 sm:$0xff]   ;;  %v1883_v31 = vld [vmem:[#allocation7 + $0x90] ss:$12 sps:$4 sm:$0xff]  }
  0x55   :  { %1565 = vmatmul.mubr.msk.bf16.vlgmr.msra.gmra.mrb[0].mxu0 %vm167_vm0, %v1857_v5  ;;  %1567 = vmatmul.mubr.msk.bf16.vlgmr.msra.gmra.mrb[0].mxu1 %vm167_vm0, %v1857_v5  ;;  %v1898_v25 = vld [vmem:[#allocation7 + $0x20] ss:$12 sps:$4 sm:$0xff]   ;;  %v1903_v29 = vld [vmem:[#allocation7 + $0x38] ss:$12 sps:$4 sm:$0xff]   ;;  %v1908_v33 = vld [vmem:[#allocation7 + $0x50] ss:$12 sps:$4 sm:$0xff]  }
  0x56   :  { %216 = vmatprep.mubr.bf16.mxu0 %v2161_v0  ;;  %962 = vmatpush1.bf16.msra.mxu0 %v1865_v10  ;;  %v1885_v28 = vld [vmem:[#allocation7 + $0x94] ss:$12 sps:$4 sm:$0xff]   ;;  %v1888_v32 = vld [vmem:[#allocation7 + $0xac] ss:$12 sps:$4 sm:$0xff]   ;;  %v1891_v36 = vld [vmem:[#allocation7 + $0xc4] ss:$12 sps:$4 sm:$0xff]  }
  0x57   :  { %963 = vmatprep.subr.bf16.mxu0 %v1870_v12  ;;  %269 = vmatprep.mubr.bf16.mxu1 %v2161_v0  ;;  %v1912_v34 = vld [vmem:[#allocation7 + $0x128] ss:$12 sps:$4 sm:$0xff]   ;;  %v1889_v38 = vld [vmem:[#allocation7 + $0xc0] ss:$12 sps:$4 sm:$0xff]   ;;  %v1894_v42 = vld [vmem:[#allocation7 + $0xd8] ss:$12 sps:$4 sm:$0xff]  }
  0x58   :  { %1710 = vmatpush3.bf16.msra.mxu1 %v1893_v21  ;;  %v1886_v35 = vld [vmem:[#allocation7 + $0xa8] ss:$12 sps:$4 sm:$0xff]   ;;  %v1917_v39 = vld [vmem:[#allocation7 + $0x140] ss:$12 sps:$4 sm:$0xff]   ;;  %v1899_v44 = vld [vmem:[#allocation7 + $0xf0] ss:$12 sps:$4 sm:$0xff]  }
  0x59   :  { %1711 = vmatprep.subr.bf16.mxu1 %v1897_v24  ;;  %v1913_v37 = vld [vmem:[#allocation7 + $0x68] ss:$12 sps:$4 sm:$0xff]   ;;  %v1918_v41 = vld [vmem:[#allocation7 + $0x80] ss:$12 sps:$4 sm:$0xff]   ;;  %v1911_v47 = vld [vmem:[#allocation7 + $0x124] ss:$12 sps:$4 sm:$0xff]  }
  0x5a   :  { %964 = vmatpush1.bf16.msra.mxu0 %v1868_v13  ;;  %v1896_v40 = vld [vmem:[#allocation7 + $0xdc] ss:$12 sps:$4 sm:$0xff]   ;;  %v1901_v43 = vld [vmem:[#allocation7 + $0xf4] ss:$12 sps:$4 sm:$0xff]   ;;  %v1906_v45 = vld [vmem:[#allocation7 + $0x10c] ss:$12 sps:$4 sm:$0xff]  }
  0x5b   :  { %965 = vmatprep.subr.bf16.mxu0 %v1873_v14  ;;  %v1904_v46 = vld [vmem:[#allocation7 + $0x108] ss:$12 sps:$4 sm:$0xff]   ;;  %v1909_v48 = vld [vmem:[#allocation7 + $0x120] ss:$12 sps:$4 sm:$0xff]   ;;  %v1914_v50 = vld [vmem:[#allocation7 + $0x138] ss:$12 sps:$4 sm:$0xff]  }
  0x5c   :  { %1712 = vmatpush3.bf16.msra.mxu1 %v1898_v25  ;;  %v1916_v49 = vld [vmem:[#allocation7 + $0x13c] ss:$12 sps:$4 sm:$0xff]   ;;  %v1921_v51 = vld [vmem:[#allocation7 + $0x154] ss:$12 sps:$4 sm:$0xff]   ;;  %v1922_v52 = vld [vmem:[#allocation7 + $0x158] ss:$12 sps:$4 sm:$0xff]  }
  0x5d   :  { %1566 = vmatmul.mubr.msk.bf16.gmra.mrb[4].mxu0 %vm167_vm0, %v1858_v15  ;;  %1568 = vmatmul.mubr.msk.bf16.gmra.mrb[4].mxu1 %vm167_vm0, %v1858_v15  ;;  %v1919_v53 = vld [vmem:[#allocation7 + $0x150] ss:$12 sps:$4 sm:$0xff]   ;;  %v1923_v54 = vld [vmem:[#allocation7 + $0x98] ss:$12 sps:$4 sm:$0xff]   ;;  %v1924_v57 = vld [vmem:[#allocation7 + $0x168] ss:$12 sps:$4 sm:$0xff]  }
  0x5e   :  { %966 = vmatpush1.bf16.msra.mxu0 %v1871_v16  ;;  %1713 = vmatprep.subr.bf16.mxu1 %v1902_v27  ;;  %v1926_v55 = vld [vmem:[#allocation7 + $0x16c] ss:$12 sps:$4 sm:$0xff]   ;;  %v1927_v56 = vld [vmem:[#allocation7 + $0x170] ss:$12 sps:$4 sm:$0xff]   ;;  %v1932_v60 = vld [vmem:[#allocation7 + $0x248] ss:$12 sps:$4 sm:$0xff]  }
  0x5f   :  { %967 = vmatprep.subr.bf16.mxu0 %v1876_v17  ;;  %v1928_v58 = vld [vmem:[#allocation7 + $0xb0] ss:$12 sps:$4 sm:$0xff]   ;;  %v103_v1 = vsub.s32 1, %v2261_v62  ;;  %v107_v4 = vsub.s32 2, %v2261_v62  ;;  %v111_v5 = vsub.s32 3, %v2261_v62 }
  0x60   :  { %1714 = vmatpush3.bf16.msra.mxu1 %v1903_v29  ;;  %v1931_v59 = vld [vmem:[#allocation7 + $0x184] ss:$12 sps:$4 sm:$0xff]   ;;  %v1929_v24 = vld [vmem:[#allocation7 + $0x180] ss:$12 sps:$4 sm:$0xff]  }
  0x61   :  { %1715 = vmatprep.subr.bf16.mxu1 %v1907_v30  ;;  %v95_v0 = vld [vmem:[%s2333_s2] sm:$0xf] }
  0x62   :  { %968 = vmatpush1.bf16.msra.mxu0 %v1874_v18  ;;  %v100_v2 = vrot.slane %v95_v0, %v99_v63  ;;  %v104_v3 = vrot.slane %v95_v0, %v103_v1  ;;  %v2276_v11 = vrot.slane %v95_v0, %v107_v4  ;;  %v2278_v14 = vrot.slane %v95_v0, %v111_v5  ;;  %v1939_v0 = vld [vmem:[#allocation7 + $0x1b0] ss:$12 sps:$4 sm:$0xff]  }
  0x63   :  { %969 = vmatprep.subr.bf16.mxu0 %v1879_v19 }
  0x64   :  { %1716 = vmatpush3.bf16.msra.mxu1 %v1908_v33  ;;  %v1936_v33 = vld [vmem:[#allocation7 + $0x19c] ss:$12 sps:$4 sm:$0xff]  }
  0x65   :  { %1717 = vmatprep.subr.bf16.mxu1 %v1912_v34  ;;  %v1937_v34 = vld [vmem:[#allocation7 + $0x260] ss:$12 sps:$4 sm:$0xff]  }
  0x66   :  { %970 = vmatpush1.bf16.msra.mxu0 %v1877_v22 }
  0x67   :  { %971 = vmatprep.subr.bf16.mxu0 %v1882_v23 }
  0x68   :  { %1718 = vmatpush3.bf16.msra.mxu1 %v1913_v37 }
  0x69   :  { %1719 = vmatprep.subr.bf16.mxu1 %v1917_v39 }
  0x6a   :  { %972 = vmatpush1.bf16.msra.mxu0 %v1880_v26 }
  0x6b   :  { %973 = vmatprep.subr.bf16.mxu0 %v1885_v28  ;;  %v1933_v28 = vld [vmem:[#allocation7 + $0x188] ss:$12 sps:$4 sm:$0xff]  }
  0x6c   :  { %1720 = vmatpush3.bf16.msra.mxu1 %v1918_v41 }
  0x6d   :  { %1721 = vmatprep.subr.bf16.mxu1 %v1922_v52  ;;  %v1942_v52 = vld [vmem:[#allocation7 + $0x278] ss:$12 sps:$4 sm:$0xff]  }
  0x6e   :  { %974 = vmatpush1.bf16.msra.mxu0 %v1883_v31 }
  0x6f   :  { %975 = vmatprep.subr.bf16.mxu0 %v1888_v32 }
  0x70   :  { %1722 = vmatpush3.bf16.msra.mxu1 %v1923_v54 }
  0x71   :  { %1723 = vmatprep.subr.bf16.mxu1 %v1927_v56 }
  0x72   :  { %976 = vmatpush1.bf16.msra.mxu0 %v1886_v35 }
  0x73   :  { %977 = vmatprep.subr.bf16.mxu0 %v1891_v36 }
  0x74   :  { %1724 = vmatpush3.bf16.msra.mxu1 %v1928_v58 }
  0x75   :  { %1737 = vmatprep.subr.bf16.mxu1 %v1932_v60 }
  0x76   :  { %978 = vmatpush1.bf16.msra.mxu0 %v1889_v38 }
  0x77   :  { %979 = vmatprep.subr.bf16.mxu0 %v1896_v40 }
  0x7a   :  { %980 = vmatpush1.bf16.msra.mxu0 %v1894_v42 }
  0x7b   :  { %981 = vmatprep.subr.bf16.mxu0 %v1901_v43 }
  0x7e   :  { %982 = vmatpush1.bf16.msra.mxu0 %v1899_v44 }
  0x7f   :  { %983 = vmatprep.subr.bf16.mxu0 %v1906_v45 }
  0x82   :  { %984 = vmatpush1.bf16.msra.mxu0 %v1904_v46  ;;  %v1934_v46 = vld [vmem:[#allocation7 + $0x198] ss:$12 sps:$4 sm:$0xff]  }
  0x83   :  { %985 = vmatprep.subr.bf16.mxu0 %v1911_v47  ;;  %v1938_v47 = vld [vmem:[#allocation7 + $0x1a0] ss:$12 sps:$4 sm:$0xff]  }
  0x86   :  { %986 = vmatpush1.bf16.msra.mxu0 %v1909_v48 }
  0x87   :  { %987 = vmatprep.subr.bf16.mxu0 %v1916_v49 }
  0x8a   :  { %988 = vmatpush1.bf16.msra.mxu0 %v1914_v50 }
  0x8b   :  { %989 = vmatprep.subr.bf16.mxu0 %v1921_v51  ;;  %v1941_v51 = vld [vmem:[#allocation7 + $0x1b4] ss:$12 sps:$4 sm:$0xff]  }
  0x8e   :  { %990 = vmatpush1.bf16.msra.mxu0 %v1919_v53 }
  0x8f   :  { %991 = vmatprep.subr.bf16.mxu0 %v1926_v55 }
  0x92   :  { %992 = vmatpush1.bf16.msra.mxu0 %v1924_v57 }
  0x93   :  { %1014 = vmatprep.subr.bf16.mxu0 %v1931_v59 }
 0x128   :  { %v208_v6 = vpop.f32.mrb[0].mxu0  ;;  %v261_v18 = vpop.f32.mrb[0].mxu1 }
 0x129   :  { %v209_v7 = vadd.f32 %v208_v6, %v100_v2  ;;  %v210_v8 = vpop.f32.mrb[1].mxu0  ;;  %v262_v21 = vadd.f32 %v261_v18, %v2276_v11  ;;  %v263_v22 = vpop.f32.mrb[1].mxu1 }
 0x12a   :  { %v211_v9 = vadd.f32 %v210_v8, %v104_v3  ;;  %v212_v10 = vpop.f32.mrb[2].mxu0  ;;  %v264_v25 = vadd.f32 %v263_v22, %v2278_v14  ;;  %v265_v26 = vpop.f32.mrb[2].mxu1  ;;  %v1946_v8 = vld [vmem:[#allocation7 + $0x1cc] ss:$12 sps:$4 sm:$0xff]   ;;  %v1956_v22 = vld [vmem:[#allocation7 + $0x1fc] ss:$12 sps:$4 sm:$0xff]  }
 0x12b   :  { %v213_v12 = vadd.f32 %v212_v10, %v100_v2  ;;  %v214_v13 = vpop.f32.mrb[3].mxu0  ;;  %v280_v16 = vmax.f32 %v209_v7, 0.0  ;;  %v282_v30 = vmax.f32 %v262_v21, 0.0  ;;  %v266_v31 = vadd.f32 %v265_v26, %v2276_v11  ;;  %v267_v32 = vpop.f32.mrb[3].mxu1  ;;  %v1953_v21 = vld [vmem:[#allocation7 + $0x1e8] ss:$12 sps:$4 sm:$0xff]  }
 0x12c   :  { %v215_v15 = vadd.f32 %v214_v13, %v104_v3  ;;  %v281_v19 = vmax.f32 %v211_v9, 0.0  ;;  %v283_v37 = vmax.f32 %v264_v25, 0.0  ;;  %v268_v38 = vadd.f32 %v267_v32, %v2278_v14  ;;  %v1947_v9 = vld [vmem:[#allocation7 + $0x290] ss:$12 sps:$4 sm:$0xff]   ;;  %v1958_v25 = vld [vmem:[#allocation7 + $0x200] ss:$12 sps:$4 sm:$0xff]  }
 0x12d   :  { %v284_v17 = vmax.f32 %v213_v12, 0.0  ;;  %v286_v41 = vmax.f32 %v266_v31, 0.0  ;;  %v1961_v26 = vld [vmem:[#allocation7 + $0x214] ss:$12 sps:$4 sm:$0xff]   ;;  %v1967_v31 = vld [vmem:[#allocation7 + $0x2f0] ss:$12 sps:$4 sm:$0xff]  }
 0x12e   :  { %v285_v20 = vmax.f32 %v215_v15, 0.0  ;;  %v287_v45 = vmax.f32 %v268_v38, 0.0  ;;  %v1964_v32 = vld [vmem:[#allocation7 + $0x228] ss:$12 sps:$4 sm:$0xff]  }
 0x12f   :  { %v296_v23 = vpack.c.bf16 %v284_v17, %v280_v16  ;;  %v2284_v50 = vpack.c.bf16 %v286_v41, %v282_v30  ;;  %v1944_v16 = vld [vmem:[#allocation7 + $0x1c8] ss:$12 sps:$4 sm:$0xff]   ;;  %v1948_v17 = vld [vmem:[#allocation7 + $0x1d0] ss:$12 sps:$4 sm:$0xff]   ;;  %v1966_v30 = vld [vmem:[#allocation7 + $0x22c] ss:$12 sps:$4 sm:$0xff]  }
 0x130   :  { %v297_v27 = vpack.c.bf16 %v285_v20, %v281_v19  ;;  %v218_v29 = vpop.f32.mrb[4].mxu0  ;;  %v299_v54 = vpack.c.bf16 %v287_v45, %v283_v37  ;;  %v271_v55 = vpop.f32.mrb[4].mxu1  ;;  %v1952_v19 = vld [vmem:[#allocation7 + $0x2a8] ss:$12 sps:$4 sm:$0xff]   ;;  %v1972_v37 = vld [vmem:[#allocation7 + $0x258] ss:$12 sps:$4 sm:$0xff]  }
 0x131   :  { %v219_v35 = vadd.f32 %v218_v29, %v100_v2  ;;  %v220_v36 = vpop.f32.mrb[5].mxu0  ;;  %v272_v57 = vadd.f32 %v271_v55, %v2276_v11  ;;  %v273_v58 = vpop.f32.mrb[5].mxu1  ;;  %v1963_v29 = vld [vmem:[#allocation7 + $0x218] ss:$12 sps:$4 sm:$0xff]   ;;  %v1977_v38 = vld [vmem:[#allocation7 + $0x274] ss:$12 sps:$4 sm:$0xff]  }
 0x132   :  { %993 = vmatprep.mubr.bf16.mxu0 %v297_v27  ;;  %1099 = vmatprep.mubr.bf16.mxu1 %v297_v27  ;;  %v221_v39 = vadd.f32 %v220_v36, %v104_v3  ;;  %v222_v40 = vpop.f32.mrb[6].mxu0  ;;  %v274_v60 = vadd.f32 %v273_v58, %v2278_v14  ;;  %v275_v61 = vpop.f32.mrb[6].mxu1  ;;  %v1962_v27 = vld [vmem:[#allocation7 + $0x2d8] ss:$12 sps:$4 sm:$0xff]   ;;  %v1974_v36 = vld [vmem:[#allocation7 + $0x25c] ss:$12 sps:$4 sm:$0xff]  }
 0x133   :  { %994 = vmatmul.mubr.bf16.vlgmr.msra.gmra.mrb[8].mxu0 %v296_v23  ;;  %1100 = vmatmul.mubr.bf16.vlgmr.msra.gmra.mrb[8].mxu1 %v296_v23  ;;  %v288_v42 = vmax.f32 %v219_v35, 0.0  ;;  %v223_v43 = vadd.f32 %v222_v40, %v100_v2  ;;  %v224_v44 = vpop.f32.mrb[7].mxu0  ;;  %v1943_v2 = vld [vmem:[#allocation7 + $0x1b8] ss:$12 sps:$4 sm:$0xff]   ;;  %v290_v5 = vmax.f32 %v272_v57, 0.0  ;;  %v276_v6 = vadd.f32 %v275_v61, %v2276_v11  ;;  %v277_v7 = vpop.f32.mrb[7].mxu1 }
 0x134   :  { %1015 = vmatpush1.bf16.msra.mxu0 %v1929_v24  ;;  %1738 = vmatpush3.bf16.msra.mxu1 %v1933_v28  ;;  %v289_v48 = vmax.f32 %v221_v39, 0.0  ;;  %v225_v49 = vadd.f32 %v224_v44, %v104_v3  ;;  %v291_v10 = vmax.f32 %v274_v60, 0.0  ;;  %v278_v12 = vadd.f32 %v277_v7, %v2278_v14  ;;  %v1951_v11 = vld [vmem:[#allocation7 + $0x1e4] ss:$12 sps:$4 sm:$0xff]   ;;  %v1949_v14 = vld [vmem:[#allocation7 + $0x1e0] ss:$12 sps:$4 sm:$0xff]  }
 0x135   :  { %1016 = vmatprep.subr.bf16.mxu0 %v1936_v33  ;;  %1739 = vmatprep.subr.bf16.mxu1 %v1937_v34  ;;  %v292_v53 = vmax.f32 %v223_v43, 0.0  ;;  %v294_v13 = vmax.f32 %v276_v6, 0.0  ;;  %v1957_v23 = vld [vmem:[#allocation7 + $0x2c0] ss:$12 sps:$4 sm:$0xff]   ;;  %v1954_v24 = vld [vmem:[#allocation7 + $0x1f8] ss:$12 sps:$4 sm:$0xff]  }
 0x136   :  { %v293_v56 = vmax.f32 %v225_v49, 0.0  ;;  %v295_v15 = vmax.f32 %v278_v12, 0.0  ;;  %v1959_v28 = vld [vmem:[#allocation7 + $0x210] ss:$12 sps:$4 sm:$0xff]   ;;  %v1969_v35 = vld [vmem:[#allocation7 + $0x240] ss:$12 sps:$4 sm:$0xff]  }
 0x137   :  { %v300_v59 = vpack.c.bf16 %v292_v53, %v288_v42  ;;  %v2290_v18 = vpack.c.bf16 %v294_v13, %v290_v5  ;;  %v1968_v33 = vld [vmem:[#allocation7 + $0x230] ss:$12 sps:$4 sm:$0xff]   ;;  %v1980_v40 = vld [vmem:[#allocation7 + $0x28c] ss:$12 sps:$4 sm:$0xff]   ;;  %v1978_v41 = vld [vmem:[#allocation7 + $0x288] ss:$12 sps:$4 sm:$0xff]  }
 0x138   :  { %1017 = vmatpush1.bf16.msra.mxu0 %v1934_v46  ;;  %1740 = vmatpush3.bf16.msra.mxu1 %v1938_v47  ;;  %v301_v3 = vpack.c.bf16 %v293_v56, %v289_v48  ;;  %v2292_v20 = vpack.c.bf16 %v295_v15, %v291_v10  ;;  %v1971_v34 = vld [vmem:[#allocation7 + $0x244] ss:$12 sps:$4 sm:$0xff]   ;;  %v1981_v43 = vld [vmem:[#allocation7 + $0x2a0] ss:$12 sps:$4 sm:$0xff]   ;;  %v1986_v44 = vld [vmem:[#allocation7 + $0x2bc] ss:$12 sps:$4 sm:$0xff]  }
 0x139   :  { %1018 = vmatprep.subr.bf16.mxu0 %v1941_v51  ;;  %1741 = vmatprep.subr.bf16.mxu1 %v1942_v52  ;;  %v1975_v39 = vld [vmem:[#allocation7 + $0x270] ss:$12 sps:$4 sm:$0xff]   ;;  %v1984_v45 = vld [vmem:[#allocation7 + $0x2b8] ss:$12 sps:$4 sm:$0xff]   ;;  %v1989_v46 = vld [vmem:[#allocation7 + $0x2d4] ss:$12 sps:$4 sm:$0xff]  }
 0x13a   :  { %1107 = vmatprep.mubr.bf16.mxu1 %v301_v3  ;;  %1003 = vmatprep.mubr.bf16.mxu0 %v301_v3  ;;  %v1983_v42 = vld [vmem:[#allocation7 + $0x2a4] ss:$12 sps:$4 sm:$0xff]   ;;  %v1992_v48 = vld [vmem:[#allocation7 + $0x2ec] ss:$12 sps:$4 sm:$0xff]   ;;  %v1990_v49 = vld [vmem:[#allocation7 + $0x2e8] ss:$12 sps:$4 sm:$0xff]  }
 0x13b   :  { %1108 = vmatmul.mubr.bf16.gmra.mrb[12].mxu1 %v300_v59  ;;  %1004 = vmatmul.mubr.bf16.gmra.mrb[12].mxu0 %v300_v59  ;;  %v1987_v47 = vld [vmem:[#allocation7 + $0x2d0] ss:$12 sps:$4 sm:$0xff]   ;;  %v1993_v51 = vld [vmem:[#allocation8 + $0x40] sm:$0xff]   ;;  %v1995_v53 = vld [vmem:[#allocation8 + $0x48] sm:$0xff]  }
 0x13c   :  { %1019 = vmatpush1.bf16.msra.mxu0 %v1939_v0  ;;  %1742 = vmatpush3.bf16.msra.mxu1 %v1943_v2  ;;  %v1994_v52 = vld [vmem:[#allocation8] sm:$0xff]   ;;  %v1997_v55 = vld [vmem:[#allocation8 + $0x50] sm:$0xff]   ;;  %v1999_v57 = vld [vmem:[#allocation8 + $0x58] sm:$0xff]  }
 0x13d   :  { %1020 = vmatprep.subr.bf16.mxu0 %v1946_v8  ;;  %1743 = vmatprep.subr.bf16.mxu1 %v1947_v9  ;;  %v1998_v56 = vld [vmem:[#allocation8 + $0x10] sm:$0xff]   ;;  %v2000_v58 = vld [vmem:[#allocation8 + $0x18] sm:$0xff]   ;;  %v2002_v59 = vld [vmem:[#allocation8 + $0x20] sm:$0xff]  }
 0x13e   :  { %1148 = vmatprep.mubr.bf16.mxu1 %v299_v54  ;;  %1046 = vmatprep.mubr.bf16.mxu0 %v299_v54  ;;  %v1996_v54 = vld [vmem:[#allocation8 + $0x8] sm:$0xff]   ;;  %v2005_v0 = vld [vmem:[#allocation8 + $0x70] sm:$0xff]   ;;  %v2007_v3 = vld [vmem:[#allocation8 + $0x78] sm:$0xff]  }
 0x13f   :  { %v2003_v60 = vld [vmem:[#allocation8 + $0x68] sm:$0xff]   ;;  %v2006_v2 = vld [vmem:[#allocation8 + $0x30] sm:$0xff]   ;;  %v2008_v5 = vld [vmem:[#allocation8 + $0x38] sm:$0xff]  }
 0x140   :  { %1021 = vmatpush1.bf16.msra.mxu0 %v1944_v16  ;;  %1744 = vmatpush3.bf16.msra.mxu1 %v1948_v17  ;;  %v2004_v61 = vld [vmem:[#allocation8 + $0x28] sm:$0xff]   ;;  %v2300_v6 = vld [vmem:[#allocation8 + $0x80] sm:$0xff]  }
 0x141   :  { %1022 = vmatprep.subr.bf16.mxu0 %v1951_v11  ;;  %1745 = vmatprep.subr.bf16.mxu1 %v1952_v19 }
 0x144   :  { %1023 = vmatpush1.bf16.msra.mxu0 %v1949_v14  ;;  %1746 = vmatpush3.bf16.msra.mxu1 %v1953_v21 }
 0x145   :  { %1024 = vmatprep.subr.bf16.mxu0 %v1956_v22  ;;  %1747 = vmatprep.subr.bf16.mxu1 %v1957_v23 }
 0x148   :  { %1025 = vmatpush1.bf16.msra.mxu0 %v1954_v24  ;;  %1748 = vmatpush3.bf16.msra.mxu1 %v1958_v25 }
 0x149   :  { %1026 = vmatprep.subr.bf16.mxu0 %v1961_v26  ;;  %1749 = vmatprep.subr.bf16.mxu1 %v1962_v27 }
 0x14c   :  { %1027 = vmatpush1.bf16.msra.mxu0 %v1959_v28  ;;  %1750 = vmatpush3.bf16.msra.mxu1 %v1963_v29 }
 0x14d   :  { %1028 = vmatprep.subr.bf16.mxu0 %v1966_v30  ;;  %1751 = vmatprep.subr.bf16.mxu1 %v1967_v31 }
 0x150   :  { %1029 = vmatpush1.bf16.msra.mxu0 %v1964_v32  ;;  %1752 = vmatpush3.bf16.msra.mxu1 %v1968_v33 }
 0x151   :  { %1030 = vmatprep.subr.bf16.mxu0 %v1971_v34  ;;  %1765 = vmatprep.subr.bf16.mxu1 %v1993_v51 }
 0x153   :  { %1149 = vmatmul.mubr.bf16.vlgmr.msra.gmra.mrb[16].mxu1 %v2284_v50 }
 0x154   :  { %1031 = vmatpush1.bf16.msra.mxu0 %v1969_v35  ;;  %1156 = vmatprep.mubr.bf16.mxu1 %v2292_v20 }
 0x155   :  { %1032 = vmatprep.subr.bf16.mxu0 %v1974_v36  ;;  %1766 = vmatpush3.bf16.msra.mxu1 %v1994_v52 }
 0x156   :  { %1767 = vmatprep.subr.bf16.mxu1 %v1995_v53 }
 0x158   :  { %1033 = vmatpush1.bf16.msra.mxu0 %v1972_v37 }
 0x159   :  { %1034 = vmatprep.subr.bf16.mxu0 %v1977_v38  ;;  %1768 = vmatpush3.bf16.msra.mxu1 %v1996_v54 }
 0x15a   :  { %1769 = vmatprep.subr.bf16.mxu1 %v1997_v55 }
 0x15b   :  { %1157 = vmatmul.mubr.bf16.gmra.mrb[20].mxu1 %v2290_v18 }
 0x15c   :  { %1035 = vmatpush1.bf16.msra.mxu0 %v1975_v39 }
 0x15d   :  { %1036 = vmatprep.subr.bf16.mxu0 %v1980_v40  ;;  %1770 = vmatpush3.bf16.msra.mxu1 %v1998_v56 }
 0x15e   :  { %1771 = vmatprep.subr.bf16.mxu1 %v1999_v57 }
 0x160   :  { %1037 = vmatpush1.bf16.msra.mxu0 %v1978_v41 }
 0x161   :  { %1038 = vmatprep.subr.bf16.mxu0 %v1983_v42  ;;  %1772 = vmatpush3.bf16.msra.mxu1 %v2000_v58 }
 0x164   :  { %1039 = vmatpush1.bf16.msra.mxu0 %v1981_v43 }
 0x165   :  { %1040 = vmatprep.subr.bf16.mxu0 %v1986_v44 }
 0x168   :  { %1041 = vmatpush1.bf16.msra.mxu0 %v1984_v45 }
 0x169   :  { %1042 = vmatprep.subr.bf16.mxu0 %v1989_v46 }
 0x16c   :  { %1043 = vmatpush1.bf16.msra.mxu0 %v1987_v47 }
 0x16d   :  { %1044 = vmatprep.subr.bf16.mxu0 %v1992_v48 }
 0x170   :  { %1045 = vmatpush1.bf16.msra.mxu0 %v1990_v49 }
 0x173   :  { %1047 = vmatmul.mubr.bf16.vlgmr.msra.gmra.mrb[8].mxu0 %v2284_v50  ;;  %v2001_v50 = vld [vmem:[#allocation8 + $0x60] sm:$0xff]  }
 0x174   :  { %1056 = vmatprep.mubr.bf16.mxu0 %v2292_v20  ;;  %1773 = vmatprep.subr.bf16.mxu1 %v2001_v50  ;;  %v432_v20 = vld [vmem:[%s2335_s4] sm:$0x7] }
 0x175   :  { %1774 = vmatpush3.bf16.msra.mxu1 %v2002_v59  ;;  %v445_v14 = vrot.slane %v432_v20, %v107_v4  ;;  %v437_v46 = vrot.slane %v432_v20, %v99_v63  ;;  %v441_v47 = vrot.slane %v432_v20, %v103_v1  ;;  %v2016_v20 = vld [vmem:[#allocation8 + $0xb8] sm:$0xff]  }
 0x176   :  { %1775 = vmatprep.subr.bf16.mxu1 %v2003_v60 }
 0x179   :  { %1776 = vmatpush3.bf16.msra.mxu1 %v2004_v61 }
 0x17a   :  { %1777 = vmatprep.subr.bf16.mxu1 %v2005_v0 }
 0x17b   :  { %1057 = vmatmul.mubr.bf16.gmra.mrb[12].mxu0 %v2290_v18 }
 0x17d   :  { %1778 = vmatpush3.bf16.msra.mxu1 %v2006_v2 }
 0x17e   :  { %1779 = vmatprep.subr.bf16.mxu1 %v2007_v3  ;;  %v2010_v3 = vld [vmem:[#allocation8 + $0x88] sm:$0xff]  }
 0x181   :  { %1780 = vmatpush3.bf16.msra.mxu1 %v2008_v5 }
 0x182   :  { %1803 = vmatprep.subr.bf16.mxu1 %v2300_v6 }
 0x206   :  { %v1725_v7 = vpop.f32.mrb[8].mxu1 }
 0x207   :  { %v1726_v8 = vpop.f32.mrb[9].mxu1 }
 0x208   :  { %v1727_v9 = vadd.f32 %v1726_v8, %v1725_v7  ;;  %v1728_v10 = vpop.f32.mrb[10].mxu1 }
 0x209   :  { %v1729_v12 = vpop.f32.mrb[11].mxu1 }
 0x20a   :  { %v1730_v13 = vadd.f32 %v1729_v12, %v1728_v10  ;;  %v1102_v23 = vadd.f32 %v1727_v9, %v445_v14  ;;  %v2011_v12 = vld [vmem:[#allocation8 + $0x90] sm:$0xff]  }
 0x20c   :  { %v1105_v27 = vadd.f32 %v1730_v13, %v445_v14 }
 0x20e   :  { %v1731_v15 = vpop.f32.mrb[12].mxu1 }
 0x20f   :  { %v1732_v16 = vpop.f32.mrb[13].mxu1 }
 0x210   :  { %v1733_v17 = vadd.f32 %v1732_v16, %v1731_v15  ;;  %v1734_v18 = vpop.f32.mrb[14].mxu1 }
 0x211   :  { %v1735_v11 = vpop.f32.mrb[15].mxu1 }
 0x212   :  { %v1736_v19 = vadd.f32 %v1735_v11, %v1734_v18  ;;  %v1110_v31 = vadd.f32 %v1733_v17, %v445_v14  ;;  %v2012_v18 = vld [vmem:[#allocation8 + $0x98] sm:$0xff]   ;;  %v2013_v11 = vld [vmem:[#allocation8 + $0xa0] sm:$0xff]  }
 0x214   :  { %v1113_v36 = vadd.f32 %v1736_v19, %v445_v14  ;;  %v2015_v19 = vld [vmem:[#allocation8 + $0xb0] sm:$0xff]  }
 0x226   :  { %v1753_v21 = vpop.f32.mrb[16].mxu1 }
 0x227   :  { %v1754_v22 = vpop.f32.mrb[17].mxu1 }
 0x228   :  { %v1755_v24 = vadd.f32 %v1754_v22, %v1753_v21  ;;  %v1756_v25 = vpop.f32.mrb[18].mxu1 }
 0x229   :  { %v1757_v26 = vpop.f32.mrb[19].mxu1 }
 0x22a   :  { %v1151_v28 = vadd.f32 %v1755_v24, %v1102_v23  ;;  %v1758_v29 = vadd.f32 %v1757_v26, %v1756_v25 }
 0x22c   :  { %v1154_v30 = vadd.f32 %v1758_v29, %v1105_v27  ;;  %v1167_v32 = vmax.f32 %v1151_v28, 0.0 }
 0x22e   :  { %v1170_v33 = vmax.f32 %v1154_v30, 0.0  ;;  %v1759_v34 = vpop.f32.mrb[20].mxu1 }
 0x22f   :  { %v1760_v35 = vpop.f32.mrb[21].mxu1 }
 0x230   :  { %v1761_v37 = vadd.f32 %v1760_v35, %v1759_v34  ;;  %v1762_v38 = vpop.f32.mrb[22].mxu1  ;;  %v1179_v39 = vpack.c.bf16 %v1170_v33, %v1167_v32  ;;  %v1665_v32 = vld [vmem:[%s2337_s6] ss:$0 sm:$0xff]  ;;  %s2162_s6 = smov [#allocation10]  }
 0x231   :  { %v1763_v4 = vpop.f32.mrb[23].mxu1  ;;  %s1541_s10 = sshll.u32 %s2162_s6, 4  ;;  %s1542_s10 = int_to_ptr.vmem [resolvable:$true] %s1541_s10 }
 0x232   :  { %v1159_v40 = vadd.f32 %v1761_v37, %v1110_v31  ;;  %v1764_v41 = vadd.f32 %v1763_v4, %v1762_v38  ;;  %s2121_s11 = scalar_lea.vmem %s1542_s10, 256  ;;  %p2126_p5 = scmp.lt.s32.totalorder %s1542_s10, %s1542_s10 }
 0x233   :  { %p2122_p4 = scmp.ne.s32.totalorder %s1542_s10, %s2121_s11  ;;  %p2127_p6 = scmp.lt.s32.totalorder %s2121_s11, %s2121_s11 }
 0x234   :  { %v1173_v42 = vmax.f32 %v1159_v40, 0.0  ;;  %v1162_v43 = vadd.f32 %v1764_v41, %v1113_v36 }
 0x235   :  { %p2128_p7 = por %p2127_p6, %p2126_p5 }
 0x236   :  { %v1176_v44 = vmax.f32 %v1162_v43, 0.0 }
 0x237   :  { %p2129_p8 = pnand %p2128_p7, %p2122_p4 }
 0x238   :  { %v1182_v45 = vpack.c.bf16 %v1176_v44, %v1173_v42 }
 0x246   :  { %v1048_v48 = vpop.f32.mrb[8].mxu0 }
 0x247   :  { %v1823_v49 = vadd.f32 %v1048_v48, %v437_v46  ;;  %v1050_v51 = vpop.f32.mrb[9].mxu0 }
 0x248   :  { %v1824_v52 = vadd.f32 %v1050_v51, %v441_v47  ;;  %v1052_v53 = vpop.f32.mrb[10].mxu0 }
 0x249   :  { %v1825_v54 = vadd.f32 %v1052_v53, %v437_v46  ;;  %v1054_v55 = vpop.f32.mrb[11].mxu0  ;;  %v1165_v57 = vmax.f32 %v1823_v49, 0.0 }
 0x24a   :  { %v1826_v56 = vadd.f32 %v1054_v55, %v441_v47  ;;  %v1166_v50 = vmax.f32 %v1824_v52, 0.0 }
 0x24b   :  { %v1168_v58 = vmax.f32 %v1825_v54, 0.0 }
 0x24c   :  { %v1169_v59 = vmax.f32 %v1826_v56, 0.0 }
 0x24d   :  { %v1177_v60 = vpack.c.bf16 %v1168_v58, %v1165_v57 }
 0x24e   :  { %v1178_v61 = vpack.c.bf16 %v1169_v59, %v1166_v50  ;;  %v1058_v0 = vpop.f32.mrb[12].mxu0 }
 0x24f   :  { %v1827_v2 = vadd.f32 %v1058_v0, %v437_v46  ;;  %v1060_v63 = vpop.f32.mrb[13].mxu0 }
 0x250   :  { %v1828_v62 = vadd.f32 %v1060_v63, %v441_v47  ;;  %v1062_v1 = vpop.f32.mrb[14].mxu0  ;;  %1414 = vmatprep.mubr.bf16.mxu1 %v1178_v61 }
 0x251   :  { %v1829_v5 = vadd.f32 %v1062_v1, %v437_v46  ;;  %v1064_v7 = vpop.f32.mrb[15].mxu0  ;;  %1415 = vmatmul.mubr.bf16.vlgmr.msra.gmra.mrb[24].mxu1 %v1177_v60  ;;  %v1171_v9 = vmax.f32 %v1827_v2, 0.0 }
 0x252   :  { %v1830_v8 = vadd.f32 %v1064_v7, %v441_v47  ;;  %1804 = vmatpush3.bf16.msra.mxu1 %v2300_v6  ;;  %v1172_v13 = vmax.f32 %v1828_v62, 0.0  ;;  %v2014_v6 = vld [vmem:[#allocation8 + $0xa8] sm:$0xff]  }
 0x253   :  { %v1174_v10 = vmax.f32 %v1829_v5, 0.0  ;;  %1805 = vmatprep.subr.bf16.mxu1 %v2010_v3 }
 0x254   :  { %v1175_v15 = vmax.f32 %v1830_v8, 0.0 }
 0x255   :  { %v1180_v16 = vpack.c.bf16 %v1174_v10, %v1171_v9 }
 0x256   :  { %v1181_v17 = vpack.c.bf16 %v1175_v15, %v1172_v13  ;;  %1806 = vmatpush3.bf16.msra.mxu1 %v2010_v3 }
 0x257   :  { %1807 = vmatprep.subr.bf16.mxu1 %v2011_v12 }
 0x258   :  { %1422 = vmatprep.mubr.bf16.mxu1 %v1181_v17 }
 0x259   :  { %1423 = vmatmul.mubr.bf16.gmra.mrb[28].mxu1 %v1180_v16 }
 0x25a   :  { %1808 = vmatpush3.bf16.msra.mxu1 %v2011_v12  ;;  %1819 = vmatprep.mubr.bf16.mxu1 %v1179_v39 }
 0x25b   :  { %1809 = vmatprep.subr.bf16.mxu1 %v2012_v18 }
 0x25e   :  { %1810 = vmatpush3.bf16.msra.mxu1 %v2012_v18 }
 0x25f   :  { %1811 = vmatprep.subr.bf16.mxu1 %v2013_v11 }
 0x262   :  { %1812 = vmatpush3.bf16.msra.mxu1 %v2013_v11 }
 0x263   :  { %1813 = vmatprep.subr.bf16.mxu1 %v2014_v6 }
 0x266   :  { %1814 = vmatpush3.bf16.msra.mxu1 %v2014_v6 }
 0x267   :  { %1815 = vmatprep.subr.bf16.mxu1 %v2015_v19 }
 0x26a   :  { %1816 = vmatpush3.bf16.msra.mxu1 %v2015_v19 }
 0x26b   :  { %1817 = vmatprep.subr.bf16.mxu1 %v2016_v20 }
 0x26e   :  { %1818 = vmatpush3.bf16.msra.mxu1 %v2016_v20 }
 0x271   :  { %1820 = vmatmul.mubr.bf16.vlgmr.msra.gmra.mrb[32].mxu1 %v1182_v45 }
 0x324   :  { %v1781_v14 = vpop.f32.mrb[24].mxu1 }
 0x325   :  { %v1782_v21 = vpop.f32.mrb[25].mxu1 }
 0x326   :  { %v1783_v22 = vadd.f32 %v1782_v21, %v1781_v14  ;;  %v1784_v23 = vpop.f32.mrb[26].mxu1 }
 0x327   :  { %v1785_v24 = vpop.f32.mrb[27].mxu1 }
 0x328   :  { %v1786_v25 = vadd.f32 %v1785_v24, %v1784_v23  ;;  %v1417_v35 = vadd.f32 %v1783_v22, %v1665_v32 }
 0x32a   :  { %v1420_v40 = vadd.f32 %v1786_v25, %v1665_v32 }
 0x32c   :  { %v1787_v26 = vpop.f32.mrb[28].mxu1 }
 0x32d   :  { %v1788_v27 = vpop.f32.mrb[29].mxu1 }
 0x32e   :  { %v1789_v28 = vadd.f32 %v1788_v27, %v1787_v26  ;;  %v1790_v29 = vpop.f32.mrb[30].mxu1 }
 0x32f   :  { %v1791_v30 = vpop.f32.mrb[31].mxu1 }
 0x330   :  { %v1792_v31 = vadd.f32 %v1791_v30, %v1790_v29  ;;  %v1425_v33 = vadd.f32 %v1789_v28, %v1665_v32 }
 0x332   :  { %v1428_v38 = vadd.f32 %v1792_v31, %v1665_v32 }
 0x344   :  { %v1821_v34 = vpop.f32.mrb[32].mxu1 }
 0x345   :  { %v1474_v36 = vadd.f32 %v1821_v34, %v1425_v33  ;;  %v1465_v37 = vpop.f32.mrb[33].mxu1 }
 0x346   :  { %v1466_v39 = vadd.f32 %v1465_v37, %v1417_v35  ;;  %v1822_v4 = vpop.f32.mrb[34].mxu1 }
 0x347   :  { %v1477_v41 = vadd.f32 %v1822_v4, %v1428_v38  ;;  %v1468_v42 = vpop.f32.mrb[35].mxu1  ;;  %1484 = vmax.xlane.f32.xlu1 %v1474_v36 }
 0x348   :  { %v1469_v43 = vadd.f32 %v1468_v42, %v1420_v40  ;;  %1480 = vmax.xlane.f32.xlu0 %v1466_v39 }
 0x34b   :  { %1486 = vmax.xlane.f32.xlu1 %v1477_v41 }
 0x34c   :  { %1482 = vmax.xlane.f32.xlu0 %v1469_v43 }
 0x3d4   :  { %v1485_v44 = vpop.xlane.xlu1 %1484 }
 0x3d5   :  { %v1490_v45 = vsub.f32 %v1474_v36, %v1485_v44  ;;  %v1481_v46 = vpop.xlane.xlu0 %1480 }
 0x3d6   :  { %v1488_v47 = vsub.f32 %v1466_v39, %v1481_v46 }
 0x3d7   :  { %v1496_v51 = vmul.f32 1.442695, %v1490_v45 }
 0x3d8   :  { %v1492_v48 = vmul.f32 1.442695, %v1488_v47  ;;  %v1487_v49 = vpop.xlane.xlu1 %1486 }
 0x3d9   :  { %v1483_v52 = vpop.xlane.xlu0 %1482  ;;  %v1491_v53 = vsub.f32 %v1477_v41, %v1487_v49 }
 0x3da   :  { %2017 = vpow2.f32 %v1492_v48  ;;  %v1489_v54 = vsub.f32 %v1469_v43, %v1483_v52 }
 0x3db   :  { %2019 = vpow2.f32 %v1496_v51  ;;  %v1498_v56 = vmul.f32 1.442695, %v1491_v53 }
 0x3dc   :  { %v1494_v55 = vmul.f32 1.442695, %v1489_v54 }
 0x3de   :  { %2021 = vpow2.f32 %v1494_v55 }
 0x3df   :  { %2023 = vpow2.f32 %v1498_v56 }
 0x3e4   :  { %v2018_v57 = vpop.eup %2017 }
 0x3e5   :  { %1500 = vadd.xlane.f32.xlu0 %v2018_v57  ;;  %v2020_v58 = vpop.eup %2019 }
 0x3e8   :  { %v2022_v50 = vpop.eup %2021 }
 0x3e9   :  { %1504 = vadd.xlane.f32.xlu0 %v2020_v58  ;;  %1502 = vadd.xlane.f32.xlu1 %v2022_v50  ;;  %v2024_v59 = vpop.eup %2023 }
 0x3ed   :  { %1506 = vadd.xlane.f32.xlu1 %v2024_v59 }
 0x472   :  { %v1501_v60 = vpop.xlane.xlu0 %1500 }
 0x473   :  { %2025 = vrcp.f32 %v1501_v60 }
 0x476   :  { %v1503_v61 = vpop.xlane.xlu1 %1502  ;;  %v1505_v0 = vpop.xlane.xlu0 %1504 }
 0x477   :  { %2027 = vrcp.f32 %v1503_v61 }
 0x478   :  { %2029 = vrcp.f32 %v1505_v0 }
 0x47a   :  { %v1507_v2 = vpop.xlane.xlu1 %1506 }
 0x47b   :  { %2031 = vrcp.f32 %v1507_v2 }
 0x47d   :  { %v2026_v63 = vpop.eup %2025 }
 0x47e   :  { %v1512_v62 = vmul.f32 %v2026_v63, %v2018_v57 }
 0x481   :  { %v2028_v3 = vpop.eup %2027 }
 0x482   :  { %v1513_v1 = vmul.f32 %v2028_v3, %v2022_v50  ;;  %v2030_v5 = vpop.eup %2029 }
 0x483   :  { %v1514_v9 = vmul.f32 %v2030_v5, %v2020_v58 }
 0x484   :  { %v1701_v7 = vpack.c.bf16 %v1513_v1, %v1512_v62 }
 0x485   :  { %v2032_v8 = vpop.eup %2031 }
 0x486   :  { %v1515_v10 = vmul.f32 %v2032_v8, %v2024_v59  ;;  %1702 = vst [vmem:[#allocation10] sm:$0xff] %v1701_v7  }
 0x488   :  { %v1706_v12 = vpack.c.bf16 %v1515_v10, %v1514_v9 }
 0x48a   :  { %1708 = vst [vmem:[#allocation10 + $0x8] sm:$0xff] %v1706_v12  }
 0x48b   :  { %2132 = shalt.err (!%p2129_p8)
}
 0x48c   :  { %s2133_s14 = scalar_lea.hbm %s2338_s7, 256 }
 0x48d   :  { %p2134_p9 = scmp.ne.s32.totalorder %s2338_s7, %s2133_s14  ;;  %p2137_p10 = scmp.lt.u32.totalorder %s2133_s14, %s2338_s7 }
 0x48f   :  { %p2139_p11 = pnand %p2137_p10, %p2134_p9 }
 0x491   :  { %2142 = shalt.err (!%p2139_p11)
}
 0x492   :  { %1547 = dma.vmem_to_hbm [thread:$0]  %s1542_s10, 256, %s2338_s7, [#allocation4], %s2155_s1, %s2155_s1, %s2156_s25  }
 0x493   :  { %2149 = dma.done.wait [#allocation4], 256  }
 0x494   :  { %2150 = vsyncadd [#allocation4], 4294967040 }
 0x495   :  { %1551 = vsyncpa [#allocation3], 1 }
 0x496   :  { %1552 = vsyncpa [#allocation6], 1 }
 0x497   :  { %1553 = vsyncpa [#allocation9], 1 }
 0x498   :  { %1554 = vsyncpa [#allocation4], 1 }

// kernel: tpu_custom_call.1
= control target key start
LH: loop header
LB: loop body
LE: loop exit
PB: predicated region body
PF: predicated region fallthrough
CT: control target
= control target key end

     0   :  { %12 = vsyncpa [#allocation3], 0  ;;  %s2331_s0 = inlined_call_operand.hbm [shape: bf16[32,32], index: 0, kind: input, shape index: {}]   ;;  %s2332_s1 = inlined_call_operand.hbm [shape: bf16[32,512], index: 1, kind: input, shape index: {}]   ;;  %s2333_s2 = inlined_call_operand.vmem [shape: f32[1,512], index: 2, kind: input, shape index: {}]   ;;  %s2334_s3 = inlined_call_operand.hbm [shape: bf16[512,384], index: 3, kind: input, shape index: {}]   ;;  %s2335_s4 = inlined_call_operand.vmem [shape: f32[1,384], index: 4, kind: input, shape index: {}]   ;;  %s2336_s5 = inlined_call_operand.hbm [shape: bf16[384,128], index: 5, kind: input, shape index: {}]   ;;  %s2337_s6 = inlined_call_operand.vmem [shape: f32[1,128], index: 6, kind: input, shape index: {}]   ;;  %s2338_s7 = inlined_call_operand.hbm [shape: bf16[32,128], index: 7, kind: output, shape index: {}]  }
   0x1   :  { %13 = vsyncpa [#allocation6], 0 }
   0x2   :  { %14 = vsyncpa [#allocation9], 0 }
   0x3   :  { %15 = vsyncpa [#allocation4], 0  ;;  %s2151_s24 = smov [#allocation5]   ;;  %s2033_s28 = scalar_lea.hbm %s2332_s1, 1024 }
   0x4   :  { %s33_s25 = sshll.u32 %s2151_s24, 4  ;;  %p2034_p0 = scmp.ne.s32.totalorder %s2332_s1, %s2033_s28  ;;  %s34_s25 = int_to_ptr.vmem [resolvable:$true] %s33_s25 }
   0x5   :  { %p2037_p1 = scmp.lt.u32.totalorder %s2033_s28, %s2332_s1 }
   0x7   :  { %p2039_p2 = pnand %p2037_p1, %p2034_p0 }
   0x9   :  { %2042 = shalt.err (!%p2039_p2)
}
   0xa   :  { %s2043_s10 = scalar_lea.vmem %s34_s25, 1024  ;;  %p2048_p4 = scmp.lt.s32.totalorder %s34_s25, %s34_s25 }
   0xb   :  { %p2044_p3 = scmp.ne.s32.totalorder %s34_s25, %s2043_s10  ;;  %p2049_p5 = scmp.lt.s32.totalorder %s2043_s10, %s2043_s10 }
   0xd   :  { %p2050_p6 = por %p2049_p5, %p2048_p4 }
   0xf   :  { %p2051_p7 = pnand %p2050_p6, %p2044_p3 }
  0x11   :  { %2054 = shalt.err (!%p2051_p7)
}
  0x12   :  { %s2152_s11 = smov 256   ;;  %s2153_s12 = smov 16  }
  0x13   :  { %39 = dma.hbm_to_vmem [thread:$0]  %s2332_s1, 1024, %s34_s25, [#allocation6], %s2152_s11, %s2152_s11, %s2153_s12  }
  0x14   :  { %s2154_s15 = smov [#allocation2]   ;;  %s2055_s19 = scalar_lea.hbm %s2331_s0, 256 }
  0x15   :  { %s21_s16 = sshll.u32 %s2154_s15, 4  ;;  %p2056_p8 = scmp.ne.s32.totalorder %s2331_s0, %s2055_s19  ;;  %s22_s16 = int_to_ptr.vmem [resolvable:$true] %s21_s16 }
  0x16   :  { %p2059_p9 = scmp.lt.u32.totalorder %s2055_s19, %s2331_s0 }
  0x18   :  { %p2061_p10 = pnand %p2059_p9, %p2056_p8 }
  0x1a   :  { %2064 = shalt.err (!%p2061_p10)
}
  0x1b   :  { %s2065_s24 = scalar_lea.vmem %s22_s16, 256  ;;  %p2070_p12 = scmp.lt.s32.totalorder %s22_s16, %s22_s16 }
  0x1c   :  { %p2066_p11 = scmp.ne.s32.totalorder %s22_s16, %s2065_s24  ;;  %p2071_p13 = scmp.lt.s32.totalorder %s2065_s24, %s2065_s24 }
  0x1e   :  { %p2072_p0 = por %p2071_p13, %p2070_p12 }
  0x20   :  { %p2073_p1 = pnand %p2072_p0, %p2066_p11 }
  0x22   :  { %2076 = shalt.err (!%p2073_p1)
}
  0x23   :  { %s2155_s1 = smov 64   ;;  %s2156_s25 = smov 4  }
  0x24   :  { %27 = dma.hbm_to_vmem [thread:$0]  %s2331_s0, 256, %s22_s16, [#allocation3], %s2155_s1, %s2155_s1, %s2156_s25  }
  0x25   :  { %s2157_s28 = smov [#allocation7]   ;;  %s2077_s9 = scalar_lea.hbm %s2334_s3, 12288 }
  0x26   :  { %s47_s29 = sshll.u32 %s2157_s28, 4  ;;  %p2078_p2 = scmp.ne.s32.totalorder %s2334_s3, %s2077_s9  ;;  %s48_s29 = int_to_ptr.vmem [resolvable:$true] %s47_s29 }
  0x27   :  { %p2081_p3 = scmp.lt.u32.totalorder %s2077_s9, %s2334_s3 }
  0x29   :  { %p2083_p4 = pnand %p2081_p3, %p2078_p2 }
  0x2b   :  { %2086 = shalt.err (!%p2083_p4)
}
  0x2c   :  { %s2087_s14 = scalar_lea.vmem %s48_s29, 12288  ;;  %p2092_p6 = scmp.lt.s32.totalorder %s48_s29, %s48_s29 }
  0x2d   :  { %p2088_p5 = scmp.ne.s32.totalorder %s48_s29, %s2087_s14  ;;  %p2093_p7 = scmp.lt.s32.totalorder %s2087_s14, %s2087_s14 }
  0x2f   :  { %p2094_p8 = por %p2093_p7, %p2092_p6 }
  0x31   :  { %p2095_p9 = pnand %p2094_p8, %p2088_p5 }
  0x33   :  { %2098 = shalt.err (!%p2095_p9)
}
  0x34   :  { %s2158_s0 = smov 192   ;;  %s2159_s15 = smov 12  }
  0x35   :  { %53 = dma.hbm_to_vmem [thread:$0]  %s2334_s3, 12288, %s48_s29, [#allocation6], %s2158_s0, %s2158_s0, %s2159_s15  }
  0x36   :  { %s2160_s18 = smov [#allocation8]   ;;  %s2099_s22 = scalar_lea.hbm %s2336_s5, 3072 }
  0x37   :  { %s61_s19 = sshll.u32 %s2160_s18, 4  ;;  %p2100_p10 = scmp.ne.s32.totalorder %s2336_s5, %s2099_s22  ;;  %s62_s19 = int_to_ptr.vmem [resolvable:$true] %s61_s19 }
  0x38   :  { %p2103_p11 = scmp.lt.u32.totalorder %s2099_s22, %s2336_s5 }
  0x3a   :  { %p2105_p12 = pnand %p2103_p11, %p2100_p10 }
  0x3c   :  { %2108 = shalt.err (!%p2105_p12)
}
  0x3d   :  { %s2109_s28 = scalar_lea.vmem %s62_s19, 3072  ;;  %p2114_p0 = scmp.lt.s32.totalorder %s62_s19, %s62_s19 }
  0x3e   :  { %p2110_p13 = scmp.ne.s32.totalorder %s62_s19, %s2109_s28  ;;  %p2115_p1 = scmp.lt.s32.totalorder %s2109_s28, %s2109_s28 }
  0x40   :  { %p2116_p2 = por %p2115_p1, %p2114_p0 }
  0x42   :  { %p2117_p3 = pnand %p2116_p2, %p2110_p13 }
  0x44   :  { %2120 = shalt.err (!%p2117_p3)
}
  0x45   :  { %67 = dma.hbm_to_vmem [thread:$0]  %s2336_s5, 3072, %s62_s19, [#allocation9], %s2155_s1, %s2155_s1, %s2156_s25  }
  0x46   :  { %2143 = dma.done.wait [#allocation3], 256  }
  0x47   :  { %2144 = vsyncadd [#allocation3], 4294967040 }
  0x48   :  { %2145 = dma.done.wait [#allocation6], 13312  }
  0x49   :  { %2146 = vsyncadd [#allocation6], 4294953984 }
  0x4a   :  { %2147 = dma.done.wait [#allocation9], 3072  }
  0x4b   :  { %2148 = vsyncadd [#allocation9], 4294964224  ;;  %v2161_v0 = vmov 0   ;;  %v1851_v1 = vld [vmem:[#allocation5 + $0x4] ss:$16 sps:$4 sm:$0xff]   ;;  %vm167_vm0 = vcmask 261120   ;;  %v97_v61 = vlaneseq }
  0x4c   :  { %206 = vmatprep.mubr.bf16.mxu0 %v2161_v0  ;;  %259 = vmatprep.mubr.bf16.mxu1 %v2161_v0  ;;  %v1853_v2 = vld [vmem:[#allocation5] ss:$16 sps:$4 sm:$0xff]   ;;  %v1854_v3 = vld [vmem:[#allocation5 + $0x24] ss:$16 sps:$4 sm:$0xff]   ;;  %v1859_v6 = vld [vmem:[#allocation5 + $0xc] ss:$16 sps:$4 sm:$0xff]  }
  0x4d   :  { %174 = vmatprep.subr.bf16.mxu0 %v1851_v1  ;;  %v1856_v4 = vld [vmem:[#allocation5 + $0x20] ss:$16 sps:$4 sm:$0xff]   ;;  %v1861_v7 = vld [vmem:[#allocation5 + $0x8] ss:$16 sps:$4 sm:$0xff]   ;;  %v1862_v8 = vld [vmem:[#allocation5 + $0x2c] ss:$16 sps:$4 sm:$0xff]   ;;  %227 = vmatprep.subr.bf16.mxu1 %v1859_v6 }
  0x4e   :  { %175 = vmatpush1.bf16.msra.mxu0 %v1853_v2  ;;  %v1857_v5 = vld [vmem:[#allocation2] sm:$0xff]   ;;  %v1864_v9 = vld [vmem:[#allocation5 + $0x28] ss:$16 sps:$4 sm:$0xff]   ;;  %228 = vmatpush1.bf16.msra.mxu1 %v1861_v7  ;;  %v1865_v10 = vld [vmem:[#allocation7] ss:$12 sps:$4 sm:$0xff]   ;;  %v2261_v62 = vshrl.u32 %v97_v61, 7 }
  0x4f   :  { %176 = vmatprep.subr.bf16.mxu0 %v1854_v3  ;;  %v1867_v11 = vld [vmem:[#allocation7 + $0x4] ss:$12 sps:$4 sm:$0xff]   ;;  %229 = vmatprep.subr.bf16.mxu1 %v1862_v8  ;;  %v1870_v12 = vld [vmem:[#allocation7 + $0x1c] ss:$12 sps:$4 sm:$0xff]   ;;  %v1873_v14 = vld [vmem:[#allocation7 + $0x34] ss:$12 sps:$4 sm:$0xff]  }
  0x50   :  { %v1868_v13 = vld [vmem:[#allocation7 + $0x18] ss:$12 sps:$4 sm:$0xff]   ;;  %v1871_v16 = vld [vmem:[#allocation7 + $0x30] ss:$12 sps:$4 sm:$0xff]   ;;  %v1874_v18 = vld [vmem:[#allocation7 + $0x48] ss:$12 sps:$4 sm:$0xff]  }
  0x51   :  { %v1858_v15 = vld [vmem:[#allocation2 + $0x8] sm:$0xff]   ;;  %v1879_v19 = vld [vmem:[#allocation7 + $0x64] ss:$12 sps:$4 sm:$0xff]   ;;  %v1892_v20 = vld [vmem:[#allocation7 + $0xc8] ss:$12 sps:$4 sm:$0xff]   ;;  %v99_v63 = vsub.s32 0, %v2261_v62 }
  0x52   :  { %177 = vmatpush1.bf16.msra.mxu0 %v1856_v4  ;;  %230 = vmatpush1.bf16.msra.mxu1 %v1864_v9  ;;  %v1876_v17 = vld [vmem:[#allocation7 + $0x4c] ss:$12 sps:$4 sm:$0xff]   ;;  %v1893_v21 = vld [vmem:[#allocation7 + $0x8] ss:$12 sps:$4 sm:$0xff]   ;;  %v1907_v30 = vld [vmem:[#allocation7 + $0x110] ss:$12 sps:$4 sm:$0xff]  }
  0x53   :  { %961 = vmatprep.subr.bf16.mxu0 %v1867_v11  ;;  %v1877_v22 = vld [vmem:[#allocation7 + $0x60] ss:$12 sps:$4 sm:$0xff]   ;;  %v1882_v23 = vld [vmem:[#allocation7 + $0x7c] ss:$12 sps:$4 sm:$0xff]   ;;  %1709 = vmatprep.subr.bf16.mxu1 %v1892_v20  ;;  %v1880_v26 = vld [vmem:[#allocation7 + $0x78] ss:$12 sps:$4 sm:$0xff]  }
  0x54   :  { %v1897_v24 = vld [vmem:[#allocation7 + $0xe0] ss:$12 sps:$4 sm:$0xff]   ;;  %v1902_v27 = vld [vmem:[#allocation7 + $0xf8] ss:$12 sps:$4 sm:$0xff]   ;;  %v1883_v31 = vld [vmem:[#allocation7 + $0x90] ss:$12 sps:$4 sm:$0xff]  }
  0x55   :  { %1565 = vmatmul.mubr.msk.bf16.vlgmr.msra.gmra.mrb[0].mxu0 %vm167_vm0, %v1857_v5  ;;  %1567 = vmatmul.mubr.msk.bf16.vlgmr.msra.gmra.mrb[0].mxu1 %vm167_vm0, %v1857_v5  ;;  %v1898_v25 = vld [vmem:[#allocation7 + $0x20] ss:$12 sps:$4 sm:$0xff]   ;;  %v1903_v29 = vld [vmem:[#allocation7 + $0x38] ss:$12 sps:$4 sm:$0xff]   ;;  %v1908_v33 = vld [vmem:[#allocation7 + $0x50] ss:$12 sps:$4 sm:$0xff]  }
  0x56   :  { %216 = vmatprep.mubr.bf16.mxu0 %v2161_v0  ;;  %962 = vmatpush1.bf16.msra.mxu0 %v1865_v10  ;;  %v1885_v28 = vld [vmem:[#allocation7 + $0x94] ss:$12 sps:$4 sm:$0xff]   ;;  %v1888_v32 = vld [vmem:[#allocation7 + $0xac] ss:$12 sps:$4 sm:$0xff]   ;;  %v1891_v36 = vld [vmem:[#allocation7 + $0xc4] ss:$12 sps:$4 sm:$0xff]  }
  0x57   :  { %963 = vmatprep.subr.bf16.mxu0 %v1870_v12  ;;  %269 = vmatprep.mubr.bf16.mxu1 %v2161_v0  ;;  %v1912_v34 = vld [vmem:[#allocation7 + $0x128] ss:$12 sps:$4 sm:$0xff]   ;;  %v1889_v38 = vld [vmem:[#allocation7 + $0xc0] ss:$12 sps:$4 sm:$0xff]   ;;  %v1894_v42 = vld [vmem:[#allocation7 + $0xd8] ss:$12 sps:$4 sm:$0xff]  }
  0x58   :  { %1710 = vmatpush3.bf16.msra.mxu1 %v1893_v21  ;;  %v1886_v35 = vld [vmem:[#allocation7 + $0xa8] ss:$12 sps:$4 sm:$0xff]   ;;  %v1917_v39 = vld [vmem:[#allocation7 + $0x140] ss:$12 sps:$4 sm:$0xff]   ;;  %v1899_v44 = vld [vmem:[#allocation7 + $0xf0] ss:$12 sps:$4 sm:$0xff]  }
  0x59   :  { %1711 = vmatprep.subr.bf16.mxu1 %v1897_v24  ;;  %v1913_v37 = vld [vmem:[#allocation7 + $0x68] ss:$12 sps:$4 sm:$0xff]   ;;  %v1918_v41 = vld [vmem:[#allocation7 + $0x80] ss:$12 sps:$4 sm:$0xff]   ;;  %v1911_v47 = vld [vmem:[#allocation7 + $0x124] ss:$12 sps:$4 sm:$0xff]  }
  0x5a   :  { %964 = vmatpush1.bf16.msra.mxu0 %v1868_v13  ;;  %v1896_v40 = vld [vmem:[#allocation7 + $0xdc] ss:$12 sps:$4 sm:$0xff]   ;;  %v1901_v43 = vld [vmem:[#allocation7 + $0xf4] ss:$12 sps:$4 sm:$0xff]   ;;  %v1906_v45 = vld [vmem:[#allocation7 + $0x10c] ss:$12 sps:$4 sm:$0xff]  }
  0x5b   :  { %965 = vmatprep.subr.bf16.mxu0 %v1873_v14  ;;  %v1904_v46 = vld [vmem:[#allocation7 + $0x108] ss:$12 sps:$4 sm:$0xff]   ;;  %v1909_v48 = vld [vmem:[#allocation7 + $0x120] ss:$12 sps:$4 sm:$0xff]   ;;  %v1914_v50 = vld [vmem:[#allocation7 + $0x138] ss:$12 sps:$4 sm:$0xff]  }
  0x5c   :  { %1712 = vmatpush3.bf16.msra.mxu1 %v1898_v25  ;;  %v1916_v49 = vld [vmem:[#allocation7 + $0x13c] ss:$12 sps:$4 sm:$0xff]   ;;  %v1921_v51 = vld [vmem:[#allocation7 + $0x154] ss:$12 sps:$4 sm:$0xff]   ;;  %v1922_v52 = vld [vmem:[#allocation7 + $0x158] ss:$12 sps:$4 sm:$0xff]  }
  0x5d   :  { %1566 = vmatmul.mubr.msk.bf16.gmra.mrb[4].mxu0 %vm167_vm0, %v1858_v15  ;;  %1568 = vmatmul.mubr.msk.bf16.gmra.mrb[4].mxu1 %vm167_vm0, %v1858_v15  ;;  %v1919_v53 = vld [vmem:[#allocation7 + $0x150] ss:$12 sps:$4 sm:$0xff]   ;;  %v1923_v54 = vld [vmem:[#allocation7 + $0x98] ss:$12 sps:$4 sm:$0xff]   ;;  %v1924_v57 = vld [vmem:[#allocation7 + $0x168] ss:$12 sps:$4 sm:$0xff]  }
  0x5e   :  { %966 = vmatpush1.bf16.msra.mxu0 %v1871_v16  ;;  %1713 = vmatprep.subr.bf16.mxu1 %v1902_v27  ;;  %v1926_v55 = vld [vmem:[#allocation7 + $0x16c] ss:$12 sps:$4 sm:$0xff]   ;;  %v1927_v56 = vld [vmem:[#allocation7 + $0x170] ss:$12 sps:$4 sm:$0xff]   ;;  %v1932_v60 = vld [vmem:[#allocation7 + $0x248] ss:$12 sps:$4 sm:$0xff]  }
  0x5f   :  { %967 = vmatprep.subr.bf16.mxu0 %v1876_v17  ;;  %v1928_v58 = vld [vmem:[#allocation7 + $0xb0] ss:$12 sps:$4 sm:$0xff]   ;;  %v103_v1 = vsub.s32 1, %v2261_v62  ;;  %v107_v4 = vsub.s32 2, %v2261_v62  ;;  %v111_v5 = vsub.s32 3, %v2261_v62 }
  0x60   :  { %1714 = vmatpush3.bf16.msra.mxu1 %v1903_v29  ;;  %v1931_v59 = vld [vmem:[#allocation7 + $0x184] ss:$12 sps:$4 sm:$0xff]   ;;  %v1929_v24 = vld [vmem:[#allocation7 + $0x180] ss:$12 sps:$4 sm:$0xff]  }
  0x61   :  { %1715 = vmatprep.subr.bf16.mxu1 %v1907_v30  ;;  %v95_v0 = vld [vmem:[%s2333_s2] sm:$0xf] }
  0x62   :  { %968 = vmatpush1.bf16.msra.mxu0 %v1874_v18  ;;  %v100_v2 = vrot.slane %v95_v0, %v99_v63  ;;  %v104_v3 = vrot.slane %v95_v0, %v103_v1  ;;  %v2276_v11 = vrot.slane %v95_v0, %v107_v4  ;;  %v2278_v14 = vrot.slane %v95_v0, %v111_v5  ;;  %v1939_v0 = vld [vmem:[#allocation7 + $0x1b0] ss:$12 sps:$4 sm:$0xff]  }
  0x63   :  { %969 = vmatprep.subr.bf16.mxu0 %v1879_v19 }
  0x64   :  { %1716 = vmatpush3.bf16.msra.mxu1 %v1908_v33  ;;  %v1936_v33 = vld [vmem:[#allocation7 + $0x19c] ss:$12 sps:$4 sm:$0xff]  }
  0x65   :  { %1717 = vmatprep.subr.bf16.mxu1 %v1912_v34  ;;  %v1937_v34 = vld [vmem:[#allocation7 + $0x260] ss:$12 sps:$4 sm:$0xff]  }
  0x66   :  { %970 = vmatpush1.bf16.msra.mxu0 %v1877_v22 }
  0x67   :  { %971 = vmatprep.subr.bf16.mxu0 %v1882_v23 }
  0x68   :  { %1718 = vmatpush3.bf16.msra.mxu1 %v1913_v37 }
  0x69   :  { %1719 = vmatprep.subr.bf16.mxu1 %v1917_v39 }
  0x6a   :  { %972 = vmatpush1.bf16.msra.mxu0 %v1880_v26 }
  0x6b   :  { %973 = vmatprep.subr.bf16.mxu0 %v1885_v28  ;;  %v1933_v28 = vld [vmem:[#allocation7 + $0x188] ss:$12 sps:$4 sm:$0xff]  }
  0x6c   :  { %1720 = vmatpush3.bf16.msra.mxu1 %v1918_v41 }
  0x6d   :  { %1721 = vmatprep.subr.bf16.mxu1 %v1922_v52  ;;  %v1942_v52 = vld [vmem:[#allocation7 + $0x278] ss:$12 sps:$4 sm:$0xff]  }
  0x6e   :  { %974 = vmatpush1.bf16.msra.mxu0 %v1883_v31 }
  0x6f   :  { %975 = vmatprep.subr.bf16.mxu0 %v1888_v32 }
  0x70   :  { %1722 = vmatpush3.bf16.msra.mxu1 %v1923_v54 }
  0x71   :  { %1723 = vmatprep.subr.bf16.mxu1 %v1927_v56 }
  0x72   :  { %976 = vmatpush1.bf16.msra.mxu0 %v1886_v35 }
  0x73   :  { %977 = vmatprep.subr.bf16.mxu0 %v1891_v36 }
  0x74   :  { %1724 = vmatpush3.bf16.msra.mxu1 %v1928_v58 }
  0x75   :  { %1737 = vmatprep.subr.bf16.mxu1 %v1932_v60 }
  0x76   :  { %978 = vmatpush1.bf16.msra.mxu0 %v1889_v38 }
  0x77   :  { %979 = vmatprep.subr.bf16.mxu0 %v1896_v40 }
  0x7a   :  { %980 = vmatpush1.bf16.msra.mxu0 %v1894_v42 }
  0x7b   :  { %981 = vmatprep.subr.bf16.mxu0 %v1901_v43 }
  0x7e   :  { %982 = vmatpush1.bf16.msra.mxu0 %v1899_v44 }
  0x7f   :  { %983 = vmatprep.subr.bf16.mxu0 %v1906_v45 }
  0x82   :  { %984 = vmatpush1.bf16.msra.mxu0 %v1904_v46  ;;  %v1934_v46 = vld [vmem:[#allocation7 + $0x198] ss:$12 sps:$4 sm:$0xff]  }
  0x83   :  { %985 = vmatprep.subr.bf16.mxu0 %v1911_v47  ;;  %v1938_v47 = vld [vmem:[#allocation7 + $0x1a0] ss:$12 sps:$4 sm:$0xff]  }
  0x86   :  { %986 = vmatpush1.bf16.msra.mxu0 %v1909_v48 }
  0x87   :  { %987 = vmatprep.subr.bf16.mxu0 %v1916_v49 }
  0x8a   :  { %988 = vmatpush1.bf16.msra.mxu0 %v1914_v50 }
  0x8b   :  { %989 = vmatprep.subr.bf16.mxu0 %v1921_v51  ;;  %v1941_v51 = vld [vmem:[#allocation7 + $0x1b4] ss:$12 sps:$4 sm:$0xff]  }
  0x8e   :  { %990 = vmatpush1.bf16.msra.mxu0 %v1919_v53 }
  0x8f   :  { %991 = vmatprep.subr.bf16.mxu0 %v1926_v55 }
  0x92   :  { %992 = vmatpush1.bf16.msra.mxu0 %v1924_v57 }
  0x93   :  { %1014 = vmatprep.subr.bf16.mxu0 %v1931_v59 }
 0x128   :  { %v208_v6 = vpop.f32.mrb[0].mxu0  ;;  %v261_v18 = vpop.f32.mrb[0].mxu1 }
 0x129   :  { %v209_v7 = vadd.f32 %v208_v6, %v100_v2  ;;  %v210_v8 = vpop.f32.mrb[1].mxu0  ;;  %v262_v21 = vadd.f32 %v261_v18, %v2276_v11  ;;  %v263_v22 = vpop.f32.mrb[1].mxu1 }
 0x12a   :  { %v211_v9 = vadd.f32 %v210_v8, %v104_v3  ;;  %v212_v10 = vpop.f32.mrb[2].mxu0  ;;  %v264_v25 = vadd.f32 %v263_v22, %v2278_v14  ;;  %v265_v26 = vpop.f32.mrb[2].mxu1  ;;  %v1946_v8 = vld [vmem:[#allocation7 + $0x1cc] ss:$12 sps:$4 sm:$0xff]   ;;  %v1956_v22 = vld [vmem:[#allocation7 + $0x1fc] ss:$12 sps:$4 sm:$0xff]  }
 0x12b   :  { %v213_v12 = vadd.f32 %v212_v10, %v100_v2  ;;  %v214_v13 = vpop.f32.mrb[3].mxu0  ;;  %v280_v16 = vmax.f32 %v209_v7, 0.0  ;;  %v282_v30 = vmax.f32 %v262_v21, 0.0  ;;  %v266_v31 = vadd.f32 %v265_v26, %v2276_v11  ;;  %v267_v32 = vpop.f32.mrb[3].mxu1  ;;  %v1953_v21 = vld [vmem:[#allocation7 + $0x1e8] ss:$12 sps:$4 sm:$0xff]  }
 0x12c   :  { %v215_v15 = vadd.f32 %v214_v13, %v104_v3  ;;  %v281_v19 = vmax.f32 %v211_v9, 0.0  ;;  %v283_v37 = vmax.f32 %v264_v25, 0.0  ;;  %v268_v38 = vadd.f32 %v267_v32, %v2278_v14  ;;  %v1947_v9 = vld [vmem:[#allocation7 + $0x290] ss:$12 sps:$4 sm:$0xff]   ;;  %v1958_v25 = vld [vmem:[#allocation7 + $0x200] ss:$12 sps:$4 sm:$0xff]  }
 0x12d   :  { %v284_v17 = vmax.f32 %v213_v12, 0.0  ;;  %v286_v41 = vmax.f32 %v266_v31, 0.0  ;;  %v1961_v26 = vld [vmem:[#allocation7 + $0x214] ss:$12 sps:$4 sm:$0xff]   ;;  %v1967_v31 = vld [vmem:[#allocation7 + $0x2f0] ss:$12 sps:$4 sm:$0xff]  }
 0x12e   :  { %v285_v20 = vmax.f32 %v215_v15, 0.0  ;;  %v287_v45 = vmax.f32 %v268_v38, 0.0  ;;  %v1964_v32 = vld [vmem:[#allocation7 + $0x228] ss:$12 sps:$4 sm:$0xff]  }
 0x12f   :  { %v296_v23 = vpack.c.bf16 %v284_v17, %v280_v16  ;;  %v2284_v50 = vpack.c.bf16 %v286_v41, %v282_v30  ;;  %v1944_v16 = vld [vmem:[#allocation7 + $0x1c8] ss:$12 sps:$4 sm:$0xff]   ;;  %v1948_v17 = vld [vmem:[#allocation7 + $0x1d0] ss:$12 sps:$4 sm:$0xff]   ;;  %v1966_v30 = vld [vmem:[#allocation7 + $0x22c] ss:$12 sps:$4 sm:$0xff]  }
 0x130   :  { %v297_v27 = vpack.c.bf16 %v285_v20, %v281_v19  ;;  %v218_v29 = vpop.f32.mrb[4].mxu0  ;;  %v299_v54 = vpack.c.bf16 %v287_v45, %v283_v37  ;;  %v271_v55 = vpop.f32.mrb[4].mxu1  ;;  %v1952_v19 = vld [vmem:[#allocation7 + $0x2a8] ss:$12 sps:$4 sm:$0xff]   ;;  %v1972_v37 = vld [vmem:[#allocation7 + $0x258] ss:$12 sps:$4 sm:$0xff]  }
 0x131   :  { %v219_v35 = vadd.f32 %v218_v29, %v100_v2  ;;  %v220_v36 = vpop.f32.mrb[5].mxu0  ;;  %v272_v57 = vadd.f32 %v271_v55, %v2276_v11  ;;  %v273_v58 = vpop.f32.mrb[5].mxu1  ;;  %v1963_v29 = vld [vmem:[#allocation7 + $0x218] ss:$12 sps:$4 sm:$0xff]   ;;  %v1977_v38 = vld [vmem:[#allocation7 + $0x274] ss:$12 sps:$4 sm:$0xff]  }
 0x132   :  { %993 = vmatprep.mubr.bf16.mxu0 %v297_v27  ;;  %1099 = vmatprep.mubr.bf16.mxu1 %v297_v27  ;;  %v221_v39 = vadd.f32 %v220_v36, %v104_v3  ;;  %v222_v40 = vpop.f32.mrb[6].mxu0  ;;  %v274_v60 = vadd.f32 %v273_v58, %v2278_v14  ;;  %v275_v61 = vpop.f32.mrb[6].mxu1  ;;  %v1962_v27 = vld [vmem:[#allocation7 + $0x2d8] ss:$12 sps:$4 sm:$0xff]   ;;  %v1974_v36 = vld [vmem:[#allocation7 + $0x25c] ss:$12 sps:$4 sm:$0xff]  }
 0x133   :  { %994 = vmatmul.mubr.bf16.vlgmr.msra.gmra.mrb[8].mxu0 %v296_v23  ;;  %1100 = vmatmul.mubr.bf16.vlgmr.msra.gmra.mrb[8].mxu1 %v296_v23  ;;  %v288_v42 = vmax.f32 %v219_v35, 0.0  ;;  %v223_v43 = vadd.f32 %v222_v40, %v100_v2  ;;  %v224_v44 = vpop.f32.mrb[7].mxu0  ;;  %v1943_v2 = vld [vmem:[#allocation7 + $0x1b8] ss:$12 sps:$4 sm:$0xff]   ;;  %v290_v5 = vmax.f32 %v272_v57, 0.0  ;;  %v276_v6 = vadd.f32 %v275_v61, %v2276_v11  ;;  %v277_v7 = vpop.f32.mrb[7].mxu1 }
 0x134   :  { %1015 = vmatpush1.bf16.msra.mxu0 %v1929_v24  ;;  %1738 = vmatpush3.bf16.msra.mxu1 %v1933_v28  ;;  %v289_v48 = vmax.f32 %v221_v39, 0.0  ;;  %v225_v49 = vadd.f32 %v224_v44, %v104_v3  ;;  %v291_v10 = vmax.f32 %v274_v60, 0.0  ;;  %v278_v12 = vadd.f32 %v277_v7, %v2278_v14  ;;  %v1951_v11 = vld [vmem:[#allocation7 + $0x1e4] ss:$12 sps:$4 sm:$0xff]   ;;  %v1949_v14 = vld [vmem:[#allocation7 + $0x1e0] ss:$12 sps:$4 sm:$0xff]  }
 0x135   :  { %1016 = vmatprep.subr.bf16.mxu0 %v1936_v33  ;;  %1739 = vmatprep.subr.bf16.mxu1 %v1937_v34  ;;  %v292_v53 = vmax.f32 %v223_v43, 0.0  ;;  %v294_v13 = vmax.f32 %v276_v6, 0.0  ;;  %v1957_v23 = vld [vmem:[#allocation7 + $0x2c0] ss:$12 sps:$4 sm:$0xff]   ;;  %v1954_v24 = vld [vmem:[#allocation7 + $0x1f8] ss:$12 sps:$4 sm:$0xff]  }
 0x136   :  { %v293_v56 = vmax.f32 %v225_v49, 0.0  ;;  %v295_v15 = vmax.f32 %v278_v12, 0.0  ;;  %v1959_v28 = vld [vmem:[#allocation7 + $0x210] ss:$12 sps:$4 sm:$0xff]   ;;  %v1969_v35 = vld [vmem:[#allocation7 + $0x240] ss:$12 sps:$4 sm:$0xff]  }
 0x137   :  { %v300_v59 = vpack.c.bf16 %v292_v53, %v288_v42  ;;  %v2290_v18 = vpack.c.bf16 %v294_v13, %v290_v5  ;;  %v1968_v33 = vld [vmem:[#allocation7 + $0x230] ss:$12 sps:$4 sm:$0xff]   ;;  %v1980_v40 = vld [vmem:[#allocation7 + $0x28c] ss:$12 sps:$4 sm:$0xff]   ;;  %v1978_v41 = vld [vmem:[#allocation7 + $0x288] ss:$12 sps:$4 sm:$0xff]  }
 0x138   :  { %1017 = vmatpush1.bf16.msra.mxu0 %v1934_v46  ;;  %1740 = vmatpush3.bf16.msra.mxu1 %v1938_v47  ;;  %v301_v3 = vpack.c.bf16 %v293_v56, %v289_v48  ;;  %v2292_v20 = vpack.c.bf16 %v295_v15, %v291_v10  ;;  %v1971_v34 = vld [vmem:[#allocation7 + $0x244] ss:$12 sps:$4 sm:$0xff]   ;;  %v1981_v43 = vld [vmem:[#allocation7 + $0x2a0] ss:$12 sps:$4 sm:$0xff]   ;;  %v1986_v44 = vld [vmem:[#allocation7 + $0x2bc] ss:$12 sps:$4 sm:$0xff]  }
 0x139   :  { %1018 = vmatprep.subr.bf16.mxu0 %v1941_v51  ;;  %1741 = vmatprep.subr.bf16.mxu1 %v1942_v52  ;;  %v1975_v39 = vld [vmem:[#allocation7 + $0x270] ss:$12 sps:$4 sm:$0xff]   ;;  %v1984_v45 = vld [vmem:[#allocation7 + $0x2b8] ss:$12 sps:$4 sm:$0xff]   ;;  %v1989_v46 = vld [vmem:[#allocation7 + $0x2d4] ss:$12 sps:$4 sm:$0xff]  }
 0x13a   :  { %1107 = vmatprep.mubr.bf16.mxu1 %v301_v3  ;;  %1003 = vmatprep.mubr.bf16.mxu0 %v301_v3  ;;  %v1983_v42 = vld [vmem:[#allocation7 + $0x2a4] ss:$12 sps:$4 sm:$0xff]   ;;  %v1992_v48 = vld [vmem:[#allocation7 + $0x2ec] ss:$12 sps:$4 sm:$0xff]   ;;  %v1990_v49 = vld [vmem:[#allocation7 + $0x2e8] ss:$12 sps:$4 sm:$0xff]  }
 0x13b   :  { %1108 = vmatmul.mubr.bf16.gmra.mrb[12].mxu1 %v300_v59  ;;  %1004 = vmatmul.mubr.bf16.gmra.mrb[12].mxu0 %v300_v59  ;;  %v1987_v47 = vld [vmem:[#allocation7 + $0x2d0] ss:$12 sps:$4 sm:$0xff]   ;;  %v1993_v51 = vld [vmem:[#allocation8 + $0x40] sm:$0xff]   ;;  %v1995_v53 = vld [vmem:[#allocation8 + $0x48] sm:$0xff]  }
 0x13c   :  { %1019 = vmatpush1.bf16.msra.mxu0 %v1939_v0  ;;  %1742 = vmatpush3.bf16.msra.mxu1 %v1943_v2  ;;  %v1994_v52 = vld [vmem:[#allocation8] sm:$0xff]   ;;  %v1997_v55 = vld [vmem:[#allocation8 + $0x50] sm:$0xff]   ;;  %v1999_v57 = vld [vmem:[#allocation8 + $0x58] sm:$0xff]  }
 0x13d   :  { %1020 = vmatprep.subr.bf16.mxu0 %v1946_v8  ;;  %1743 = vmatprep.subr.bf16.mxu1 %v1947_v9  ;;  %v1998_v56 = vld [vmem:[#allocation8 + $0x10] sm:$0xff]   ;;  %v2000_v58 = vld [vmem:[#allocation8 + $0x18] sm:$0xff]   ;;  %v2002_v59 = vld [vmem:[#allocation8 + $0x20] sm:$0xff]  }
 0x13e   :  { %1148 = vmatprep.mubr.bf16.mxu1 %v299_v54  ;;  %1046 = vmatprep.mubr.bf16.mxu0 %v299_v54  ;;  %v1996_v54 = vld [vmem:[#allocation8 + $0x8] sm:$0xff]   ;;  %v2005_v0 = vld [vmem:[#allocation8 + $0x70] sm:$0xff]   ;;  %v2007_v3 = vld [vmem:[#allocation8 + $0x78] sm:$0xff]  }
 0x13f   :  { %v2003_v60 = vld [vmem:[#allocation8 + $0x68] sm:$0xff]   ;;  %v2006_v2 = vld [vmem:[#allocation8 + $0x30] sm:$0xff]   ;;  %v2008_v5 = vld [vmem:[#allocation8 + $0x38] sm:$0xff]  }
 0x140   :  { %1021 = vmatpush1.bf16.msra.mxu0 %v1944_v16  ;;  %1744 = vmatpush3.bf16.msra.mxu1 %v1948_v17  ;;  %v2004_v61 = vld [vmem:[#allocation8 + $0x28] sm:$0xff]   ;;  %v2300_v6 = vld [vmem:[#allocation8 + $0x80] sm:$0xff]  }
 0x141   :  { %1022 = vmatprep.subr.bf16.mxu0 %v1951_v11  ;;  %1745 = vmatprep.subr.bf16.mxu1 %v1952_v19 }
 0x144   :  { %1023 = vmatpush1.bf16.msra.mxu0 %v1949_v14  ;;  %1746 = vmatpush3.bf16.msra.mxu1 %v1953_v21 }
 0x145   :  { %1024 = vmatprep.subr.bf16.mxu0 %v1956_v22  ;;  %1747 = vmatprep.subr.bf16.mxu1 %v1957_v23 }
 0x148   :  { %1025 = vmatpush1.bf16.msra.mxu0 %v1954_v24  ;;  %1748 = vmatpush3.bf16.msra.mxu1 %v1958_v25 }
 0x149   :  { %1026 = vmatprep.subr.bf16.mxu0 %v1961_v26  ;;  %1749 = vmatprep.subr.bf16.mxu1 %v1962_v27 }
 0x14c   :  { %1027 = vmatpush1.bf16.msra.mxu0 %v1959_v28  ;;  %1750 = vmatpush3.bf16.msra.mxu1 %v1963_v29 }
 0x14d   :  { %1028 = vmatprep.subr.bf16.mxu0 %v1966_v30  ;;  %1751 = vmatprep.subr.bf16.mxu1 %v1967_v31 }
 0x150   :  { %1029 = vmatpush1.bf16.msra.mxu0 %v1964_v32  ;;  %1752 = vmatpush3.bf16.msra.mxu1 %v1968_v33 }
 0x151   :  { %1030 = vmatprep.subr.bf16.mxu0 %v1971_v34  ;;  %1765 = vmatprep.subr.bf16.mxu1 %v1993_v51 }
 0x153   :  { %1149 = vmatmul.mubr.bf16.vlgmr.msra.gmra.mrb[16].mxu1 %v2284_v50 }
 0x154   :  { %1031 = vmatpush1.bf16.msra.mxu0 %v1969_v35  ;;  %1156 = vmatprep.mubr.bf16.mxu1 %v2292_v20 }
 0x155   :  { %1032 = vmatprep.subr.bf16.mxu0 %v1974_v36  ;;  %1766 = vmatpush3.bf16.msra.mxu1 %v1994_v52 }
 0x156   :  { %1767 = vmatprep.subr.bf16.mxu1 %v1995_v53 }
 0x158   :  { %1033 = vmatpush1.bf16.msra.mxu0 %v1972_v37 }
 0x159   :  { %1034 = vmatprep.subr.bf16.mxu0 %v1977_v38  ;;  %1768 = vmatpush3.bf16.msra.mxu1 %v1996_v54 }
 0x15a   :  { %1769 = vmatprep.subr.bf16.mxu1 %v1997_v55 }
 0x15b   :  { %1157 = vmatmul.mubr.bf16.gmra.mrb[20].mxu1 %v2290_v18 }
 0x15c   :  { %1035 = vmatpush1.bf16.msra.mxu0 %v1975_v39 }
 0x15d   :  { %1036 = vmatprep.subr.bf16.mxu0 %v1980_v40  ;;  %1770 = vmatpush3.bf16.msra.mxu1 %v1998_v56 }
 0x15e   :  { %1771 = vmatprep.subr.bf16.mxu1 %v1999_v57 }
 0x160   :  { %1037 = vmatpush1.bf16.msra.mxu0 %v1978_v41 }
 0x161   :  { %1038 = vmatprep.subr.bf16.mxu0 %v1983_v42  ;;  %1772 = vmatpush3.bf16.msra.mxu1 %v2000_v58 }
 0x164   :  { %1039 = vmatpush1.bf16.msra.mxu0 %v1981_v43 }
 0x165   :  { %1040 = vmatprep.subr.bf16.mxu0 %v1986_v44 }
 0x168   :  { %1041 = vmatpush1.bf16.msra.mxu0 %v1984_v45 }
 0x169   :  { %1042 = vmatprep.subr.bf16.mxu0 %v1989_v46 }
 0x16c   :  { %1043 = vmatpush1.bf16.msra.mxu0 %v1987_v47 }
 0x16d   :  { %1044 = vmatprep.subr.bf16.mxu0 %v1992_v48 }
 0x170   :  { %1045 = vmatpush1.bf16.msra.mxu0 %v1990_v49 }
 0x173   :  { %1047 = vmatmul.mubr.bf16.vlgmr.msra.gmra.mrb[8].mxu0 %v2284_v50  ;;  %v2001_v50 = vld [vmem:[#allocation8 + $0x60] sm:$0xff]  }
 0x174   :  { %1056 = vmatprep.mubr.bf16.mxu0 %v2292_v20  ;;  %1773 = vmatprep.subr.bf16.mxu1 %v2001_v50  ;;  %v432_v20 = vld [vmem:[%s2335_s4] sm:$0x7] }
 0x175   :  { %1774 = vmatpush3.bf16.msra.mxu1 %v2002_v59  ;;  %v445_v14 = vrot.slane %v432_v20, %v107_v4  ;;  %v437_v46 = vrot.slane %v432_v20, %v99_v63  ;;  %v441_v47 = vrot.slane %v432_v20, %v103_v1  ;;  %v2016_v20 = vld [vmem:[#allocation8 + $0xb8] sm:$0xff]  }
 0x176   :  { %1775 = vmatprep.subr.bf16.mxu1 %v2003_v60 }
 0x179   :  { %1776 = vmatpush3.bf16.msra.mxu1 %v2004_v61 }
 0x17a   :  { %1777 = vmatprep.subr.bf16.mxu1 %v2005_v0 }
 0x17b   :  { %1057 = vmatmul.mubr.bf16.gmra.mrb[12].mxu0 %v2290_v18 }
 0x17d   :  { %1778 = vmatpush3.bf16.msra.mxu1 %v2006_v2 }
 0x17e   :  { %1779 = vmatprep.subr.bf16.mxu1 %v2007_v3  ;;  %v2010_v3 = vld [vmem:[#allocation8 + $0x88] sm:$0xff]  }
 0x181   :  { %1780 = vmatpush3.bf16.msra.mxu1 %v2008_v5 }
 0x182   :  { %1803 = vmatprep.subr.bf16.mxu1 %v2300_v6 }
 0x206   :  { %v1725_v7 = vpop.f32.mrb[8].mxu1 }
 0x207   :  { %v1726_v8 = vpop.f32.mrb[9].mxu1 }
 0x208   :  { %v1727_v9 = vadd.f32 %v1726_v8, %v1725_v7  ;;  %v1728_v10 = vpop.f32.mrb[10].mxu1 }
 0x209   :  { %v1729_v12 = vpop.f32.mrb[11].mxu1 }
 0x20a   :  { %v1730_v13 = vadd.f32 %v1729_v12, %v1728_v10  ;;  %v1102_v23 = vadd.f32 %v1727_v9, %v445_v14  ;;  %v2011_v12 = vld [vmem:[#allocation8 + $0x90] sm:$0xff]  }
 0x20c   :  { %v1105_v27 = vadd.f32 %v1730_v13, %v445_v14 }
 0x20e   :  { %v1731_v15 = vpop.f32.mrb[12].mxu1 }
 0x20f   :  { %v1732_v16 = vpop.f32.mrb[13].mxu1 }
 0x210   :  { %v1733_v17 = vadd.f32 %v1732_v16, %v1731_v15  ;;  %v1734_v18 = vpop.f32.mrb[14].mxu1 }
 0x211   :  { %v1735_v11 = vpop.f32.mrb[15].mxu1 }
 0x212   :  { %v1736_v19 = vadd.f32 %v1735_v11, %v1734_v18  ;;  %v1110_v31 = vadd.f32 %v1733_v17, %v445_v14  ;;  %v2012_v18 = vld [vmem:[#allocation8 + $0x98] sm:$0xff]   ;;  %v2013_v11 = vld [vmem:[#allocation8 + $0xa0] sm:$0xff]  }
 0x214   :  { %v1113_v36 = vadd.f32 %v1736_v19, %v445_v14  ;;  %v2015_v19 = vld [vmem:[#allocation8 + $0xb0] sm:$0xff]  }
 0x226   :  { %v1753_v21 = vpop.f32.mrb[16].mxu1 }
 0x227   :  { %v1754_v22 = vpop.f32.mrb[17].mxu1 }
 0x228   :  { %v1755_v24 = vadd.f32 %v1754_v22, %v1753_v21  ;;  %v1756_v25 = vpop.f32.mrb[18].mxu1 }
 0x229   :  { %v1757_v26 = vpop.f32.mrb[19].mxu1 }
 0x22a   :  { %v1151_v28 = vadd.f32 %v1755_v24, %v1102_v23  ;;  %v1758_v29 = vadd.f32 %v1757_v26, %v1756_v25 }
 0x22c   :  { %v1154_v30 = vadd.f32 %v1758_v29, %v1105_v27  ;;  %v1167_v32 = vmax.f32 %v1151_v28, 0.0 }
 0x22e   :  { %v1170_v33 = vmax.f32 %v1154_v30, 0.0  ;;  %v1759_v34 = vpop.f32.mrb[20].mxu1 }
 0x22f   :  { %v1760_v35 = vpop.f32.mrb[21].mxu1 }
 0x230   :  { %v1761_v37 = vadd.f32 %v1760_v35, %v1759_v34  ;;  %v1762_v38 = vpop.f32.mrb[22].mxu1  ;;  %v1179_v39 = vpack.c.bf16 %v1170_v33, %v1167_v32  ;;  %v1665_v32 = vld [vmem:[%s2337_s6] ss:$0 sm:$0xff]  ;;  %s2162_s6 = smov [#allocation10]  }
 0x231   :  { %v1763_v4 = vpop.f32.mrb[23].mxu1  ;;  %s1541_s10 = sshll.u32 %s2162_s6, 4  ;;  %s1542_s10 = int_to_ptr.vmem [resolvable:$true] %s1541_s10 }
 0x232   :  { %v1159_v40 = vadd.f32 %v1761_v37, %v1110_v31  ;;  %v1764_v41 = vadd.f32 %v1763_v4, %v1762_v38  ;;  %s2121_s11 = scalar_lea.vmem %s1542_s10, 256  ;;  %p2126_p5 = scmp.lt.s32.totalorder %s1542_s10, %s1542_s10 }
 0x233   :  { %p2122_p4 = scmp.ne.s32.totalorder %s1542_s10, %s2121_s11  ;;  %p2127_p6 = scmp.lt.s32.totalorder %s2121_s11, %s2121_s11 }
 0x234   :  { %v1173_v42 = vmax.f32 %v1159_v40, 0.0  ;;  %v1162_v43 = vadd.f32 %v1764_v41, %v1113_v36 }
 0x235   :  { %p2128_p7 = por %p2127_p6, %p2126_p5 }
 0x236   :  { %v1176_v44 = vmax.f32 %v1162_v43, 0.0 }
 0x237   :  { %p2129_p8 = pnand %p2128_p7, %p2122_p4 }
 0x238   :  { %v1182_v45 = vpack.c.bf16 %v1176_v44, %v1173_v42 }
 0x246   :  { %v1048_v48 = vpop.f32.mrb[8].mxu0 }
 0x247   :  { %v1823_v49 = vadd.f32 %v1048_v48, %v437_v46  ;;  %v1050_v51 = vpop.f32.mrb[9].mxu0 }
 0x248   :  { %v1824_v52 = vadd.f32 %v1050_v51, %v441_v47  ;;  %v1052_v53 = vpop.f32.mrb[10].mxu0 }
 0x249   :  { %v1825_v54 = vadd.f32 %v1052_v53, %v437_v46  ;;  %v1054_v55 = vpop.f32.mrb[11].mxu0  ;;  %v1165_v57 = vmax.f32 %v1823_v49, 0.0 }
 0x24a   :  { %v1826_v56 = vadd.f32 %v1054_v55, %v441_v47  ;;  %v1166_v50 = vmax.f32 %v1824_v52, 0.0 }
 0x24b   :  { %v1168_v58 = vmax.f32 %v1825_v54, 0.0 }
 0x24c   :  { %v1169_v59 = vmax.f32 %v1826_v56, 0.0 }
 0x24d   :  { %v1177_v60 = vpack.c.bf16 %v1168_v58, %v1165_v57 }
 0x24e   :  { %v1178_v61 = vpack.c.bf16 %v1169_v59, %v1166_v50  ;;  %v1058_v0 = vpop.f32.mrb[12].mxu0 }
 0x24f   :  { %v1827_v2 = vadd.f32 %v1058_v0, %v437_v46  ;;  %v1060_v63 = vpop.f32.mrb[13].mxu0 }
 0x250   :  { %v1828_v62 = vadd.f32 %v1060_v63, %v441_v47  ;;  %v1062_v1 = vpop.f32.mrb[14].mxu0  ;;  %1414 = vmatprep.mubr.bf16.mxu1 %v1178_v61 }
 0x251   :  { %v1829_v5 = vadd.f32 %v1062_v1, %v437_v46  ;;  %v1064_v7 = vpop.f32.mrb[15].mxu0  ;;  %1415 = vmatmul.mubr.bf16.vlgmr.msra.gmra.mrb[24].mxu1 %v1177_v60  ;;  %v1171_v9 = vmax.f32 %v1827_v2, 0.0 }
 0x252   :  { %v1830_v8 = vadd.f32 %v1064_v7, %v441_v47  ;;  %1804 = vmatpush3.bf16.msra.mxu1 %v2300_v6  ;;  %v1172_v13 = vmax.f32 %v1828_v62, 0.0  ;;  %v2014_v6 = vld [vmem:[#allocation8 + $0xa8] sm:$0xff]  }
 0x253   :  { %v1174_v10 = vmax.f32 %v1829_v5, 0.0  ;;  %1805 = vmatprep.subr.bf16.mxu1 %v2010_v3 }
 0x254   :  { %v1175_v15 = vmax.f32 %v1830_v8, 0.0 }
 0x255   :  { %v1180_v16 = vpack.c.bf16 %v1174_v10, %v1171_v9 }
 0x256   :  { %v1181_v17 = vpack.c.bf16 %v1175_v15, %v1172_v13  ;;  %1806 = vmatpush3.bf16.msra.mxu1 %v2010_v3 }
 0x257   :  { %1807 = vmatprep.subr.bf16.mxu1 %v2011_v12 }
 0x258   :  { %1422 = vmatprep.mubr.bf16.mxu1 %v1181_v17 }
 0x259   :  { %1423 = vmatmul.mubr.bf16.gmra.mrb[28].mxu1 %v1180_v16 }
 0x25a   :  { %1808 = vmatpush3.bf16.msra.mxu1 %v2011_v12  ;;  %1819 = vmatprep.mubr.bf16.mxu1 %v1179_v39 }
 0x25b   :  { %1809 = vmatprep.subr.bf16.mxu1 %v2012_v18 }
 0x25e   :  { %1810 = vmatpush3.bf16.msra.mxu1 %v2012_v18 }
 0x25f   :  { %1811 = vmatprep.subr.bf16.mxu1 %v2013_v11 }
 0x262   :  { %1812 = vmatpush3.bf16.msra.mxu1 %v2013_v11 }
 0x263   :  { %1813 = vmatprep.subr.bf16.mxu1 %v2014_v6 }
 0x266   :  { %1814 = vmatpush3.bf16.msra.mxu1 %v2014_v6 }
 0x267   :  { %1815 = vmatprep.subr.bf16.mxu1 %v2015_v19 }
 0x26a   :  { %1816 = vmatpush3.bf16.msra.mxu1 %v2015_v19 }
 0x26b   :  { %1817 = vmatprep.subr.bf16.mxu1 %v2016_v20 }
 0x26e   :  { %1818 = vmatpush3.bf16.msra.mxu1 %v2016_v20 }
 0x271   :  { %1820 = vmatmul.mubr.bf16.vlgmr.msra.gmra.mrb[32].mxu1 %v1182_v45 }
 0x324   :  { %v1781_v14 = vpop.f32.mrb[24].mxu1 }
 0x325   :  { %v1782_v21 = vpop.f32.mrb[25].mxu1 }
 0x326   :  { %v1783_v22 = vadd.f32 %v1782_v21, %v1781_v14  ;;  %v1784_v23 = vpop.f32.mrb[26].mxu1 }
 0x327   :  { %v1785_v24 = vpop.f32.mrb[27].mxu1 }
 0x328   :  { %v1786_v25 = vadd.f32 %v1785_v24, %v1784_v23  ;;  %v1417_v35 = vadd.f32 %v1783_v22, %v1665_v32 }
 0x32a   :  { %v1420_v40 = vadd.f32 %v1786_v25, %v1665_v32 }
 0x32c   :  { %v1787_v26 = vpop.f32.mrb[28].mxu1 }
 0x32d   :  { %v1788_v27 = vpop.f32.mrb[29].mxu1 }
 0x32e   :  { %v1789_v28 = vadd.f32 %v1788_v27, %v1787_v26  ;;  %v1790_v29 = vpop.f32.mrb[30].mxu1 }
 0x32f   :  { %v1791_v30 = vpop.f32.mrb[31].mxu1 }
 0x330   :  { %v1792_v31 = vadd.f32 %v1791_v30, %v1790_v29  ;;  %v1425_v33 = vadd.f32 %v1789_v28, %v1665_v32 }
 0x332   :  { %v1428_v38 = vadd.f32 %v1792_v31, %v1665_v32 }
 0x344   :  { %v1821_v34 = vpop.f32.mrb[32].mxu1 }
 0x345   :  { %v1474_v36 = vadd.f32 %v1821_v34, %v1425_v33  ;;  %v1465_v37 = vpop.f32.mrb[33].mxu1 }
 0x346   :  { %v1466_v39 = vadd.f32 %v1465_v37, %v1417_v35  ;;  %v1822_v4 = vpop.f32.mrb[34].mxu1 }
 0x347   :  { %v1477_v41 = vadd.f32 %v1822_v4, %v1428_v38  ;;  %v1468_v42 = vpop.f32.mrb[35].mxu1  ;;  %1484 = vmax.xlane.f32.xlu1 %v1474_v36 }
 0x348   :  { %v1469_v43 = vadd.f32 %v1468_v42, %v1420_v40  ;;  %1480 = vmax.xlane.f32.xlu0 %v1466_v39 }
 0x34b   :  { %1486 = vmax.xlane.f32.xlu1 %v1477_v41 }
 0x34c   :  { %1482 = vmax.xlane.f32.xlu0 %v1469_v43 }
 0x3d4   :  { %v1485_v44 = vpop.xlane.xlu1 %1484 }
 0x3d5   :  { %v1490_v45 = vsub.f32 %v1474_v36, %v1485_v44  ;;  %v1481_v46 = vpop.xlane.xlu0 %1480 }
 0x3d6   :  { %v1488_v47 = vsub.f32 %v1466_v39, %v1481_v46 }
 0x3d7   :  { %v1496_v51 = vmul.f32 1.442695, %v1490_v45 }
 0x3d8   :  { %v1492_v48 = vmul.f32 1.442695, %v1488_v47  ;;  %v1487_v49 = vpop.xlane.xlu1 %1486 }
 0x3d9   :  { %v1483_v52 = vpop.xlane.xlu0 %1482  ;;  %v1491_v53 = vsub.f32 %v1477_v41, %v1487_v49 }
 0x3da   :  { %2017 = vpow2.f32 %v1492_v48  ;;  %v1489_v54 = vsub.f32 %v1469_v43, %v1483_v52 }
 0x3db   :  { %2019 = vpow2.f32 %v1496_v51  ;;  %v1498_v56 = vmul.f32 1.442695, %v1491_v53 }
 0x3dc   :  { %v1494_v55 = vmul.f32 1.442695, %v1489_v54 }
 0x3de   :  { %2021 = vpow2.f32 %v1494_v55 }
 0x3df   :  { %2023 = vpow2.f32 %v1498_v56 }
 0x3e4   :  { %v2018_v57 = vpop.eup %2017 }
 0x3e5   :  { %1500 = vadd.xlane.f32.xlu0 %v2018_v57  ;;  %v2020_v58 = vpop.eup %2019 }
 0x3e8   :  { %v2022_v50 = vpop.eup %2021 }
 0x3e9   :  { %1504 = vadd.xlane.f32.xlu0 %v2020_v58  ;;  %1502 = vadd.xlane.f32.xlu1 %v2022_v50  ;;  %v2024_v59 = vpop.eup %2023 }
 0x3ed   :  { %1506 = vadd.xlane.f32.xlu1 %v2024_v59 }
 0x472   :  { %v1501_v60 = vpop.xlane.xlu0 %1500 }
 0x473   :  { %2025 = vrcp.f32 %v1501_v60 }
 0x476   :  { %v1503_v61 = vpop.xlane.xlu1 %1502  ;;  %v1505_v0 = vpop.xlane.xlu0 %1504 }
 0x477   :  { %2027 = vrcp.f32 %v1503_v61 }
 0x478   :  { %2029 = vrcp.f32 %v1505_v0 }
 0x47a   :  { %v1507_v2 = vpop.xlane.xlu1 %1506 }
 0x47b   :  { %2031 = vrcp.f32 %v1507_v2 }
 0x47d   :  { %v2026_v63 = vpop.eup %2025 }
 0x47e   :  { %v1512_v62 = vmul.f32 %v2026_v63, %v2018_v57 }
 0x481   :  { %v2028_v3 = vpop.eup %2027 }
 0x482   :  { %v1513_v1 = vmul.f32 %v2028_v3, %v2022_v50  ;;  %v2030_v5 = vpop.eup %2029 }
 0x483   :  { %v1514_v9 = vmul.f32 %v2030_v5, %v2020_v58 }
 0x484   :  { %v1701_v7 = vpack.c.bf16 %v1513_v1, %v1512_v62 }
 0x485   :  { %v2032_v8 = vpop.eup %2031 }
 0x486   :  { %v1515_v10 = vmul.f32 %v2032_v8, %v2024_v59  ;;  %1702 = vst [vmem:[#allocation10] sm:$0xff] %v1701_v7  }
 0x488   :  { %v1706_v12 = vpack.c.bf16 %v1515_v10, %v1514_v9 }
 0x48a   :  { %1708 = vst [vmem:[#allocation10 + $0x8] sm:$0xff] %v1706_v12  }
 0x48b   :  { %2132 = shalt.err (!%p2129_p8)
}
 0x48c   :  { %s2133_s14 = scalar_lea.hbm %s2338_s7, 256 }
 0x48d   :  { %p2134_p9 = scmp.ne.s32.totalorder %s2338_s7, %s2133_s14  ;;  %p2137_p10 = scmp.lt.u32.totalorder %s2133_s14, %s2338_s7 }
 0x48f   :  { %p2139_p11 = pnand %p2137_p10, %p2134_p9 }
 0x491   :  { %2142 = shalt.err (!%p2139_p11)
}
 0x492   :  { %1547 = dma.vmem_to_hbm [thread:$0]  %s1542_s10, 256, %s2338_s7, [#allocation4], %s2155_s1, %s2155_s1, %s2156_s25  }
 0x493   :  { %2149 = dma.done.wait [#allocation4], 256  }
 0x494   :  { %2150 = vsyncadd [#allocation4], 4294967040 }
 0x495   :  { %1551 = vsyncpa [#allocation3], 1 }
 0x496   :  { %1552 = vsyncpa [#allocation6], 1 }
 0x497   :  { %1553 = vsyncpa [#allocation9], 1 }
 0x498   :  { %1554 = vsyncpa [#allocation4], 1 }

</bundles_post_ra>
